<compile_context>
chip_gen: v7x
topology: tpu7x:2x2x1
jax: 0.10.0
libtpu: 0.0.40
codegen_flags: <defaults>
</compile_context>

<pallas_src>
import functools
import math

import jax
import jax.numpy as jnp
from jax import lax
from jax.experimental import pallas as pl
from jax.experimental.pallas import tpu as pltpu


def _rgcn_kernel(HS, seq, seq_pad,
                 x_ref, A_ref, wih_ref, whh_ref, b_ref,
                 Wg_ref, bg_ref, Wu_ref, bu_ref, wd_ref,
                 y_ref):
    """Full recurrence + dense head for one graph; everything VMEM resident.

    x_ref  : (seq, bs, in_pad) bf16   raw (time-major, padded) inputs
    A_ref  : (bs, bs)          bf16   adjacency / distance matrix
    wih_ref: (in_pad, 4HS)     bf16   input gate weights, gates = [i,f,o,g]
    whh_ref: (HS, 4HS)         bf16   recurrent gate weights, gates = [i,f,o,g]
    b_ref  : (1, 4HS)          f32    gate bias
    Wg_ref : (2HS, 2HS)        bf16   blockdiag(W_graph_h, W_graph_c)
    bg_ref : (1, 2HS)          f32    [b_graph_h | b_graph_c]
    Wu_ref : (4HS, 2HS)        bf16   rows [h_cur; c_cur; h_graph; c_graph]
    bu_ref : (1, 2HS)          f32    [b_h | b_c]
    wd_ref : (HS, seq_pad)     bf16   w_dense replicated across all lanes
    y_ref  : (bs, seq_pad)     f32    dense-head output, lane t = time step t
    """
    bs = A_ref.shape[0]

    # Tiny operands at river-dl sizes: load once, keep resident.
    A = A_ref[...]
    wih = wih_ref[...]
    whh = whh_ref[...]
    b = b_ref[...]
    Wg = Wg_ref[...]
    bg = bg_ref[...]
    Wu = Wu_ref[...]
    bu = bu_ref[...]
    wd = wd_ref[...]

    lane4 = lax.broadcasted_iota(jnp.int32, (bs, 4 * HS), 1)   # gate lanes
    lanet = lax.broadcasted_iota(jnp.int32, (bs, seq_pad), 1)  # output lanes

    def step(t, carry):
        hc, y = carry                                # (bs,2HS) f32, (bs,seq_pad) f32
        hc_bf = hc.astype(jnp.bfloat16)

        # ---- LSTM-style gates, column order [i, f, o, g] ---------------------
        gates = (jnp.dot(x_ref[t], wih, preferred_element_type=jnp.float32)
                 + jnp.dot(hc_bf[:, :HS], whh, preferred_element_type=jnp.float32)
                 + b)
        # one full-width activation select: sigmoid on [i|f|o], tanh on g
        act = jnp.where(lane4 < 3 * HS, jax.nn.sigmoid(gates), jnp.tanh(gates))
        i_t = act[:, :HS]
        f_t = act[:, HS:2 * HS]
        o_t = act[:, 2 * HS:3 * HS]
        g_t = act[:, 3 * HS:]
        c = hc[:, HS:]
        c_cur = f_t * c + i_t * g_t
        h_cur = o_t * jnp.tanh(c)        # uses *previous* c (matches PyTorch)

        # ---- graph convolution on previous (h, c): fused block-diagonal ------
        gpre = jnp.dot(hc_bf, Wg, preferred_element_type=jnp.float32) + bg
        graph = jnp.tanh(jnp.dot(A, gpre.astype(jnp.bfloat16),
                                 preferred_element_type=jnp.float32))  # [h_g|c_g]

        # ---- fused update: one (bs,4HS)@(4HS,2HS) dot + one sigmoid ----------
        u = jnp.concatenate([h_cur, c_cur, graph], axis=-1).astype(jnp.bfloat16)
        hc_new = jax.nn.sigmoid(
            jnp.dot(u, Wu, preferred_element_type=jnp.float32) + bu)

        # ---- dense head (off the recurrence chain): y_t placed at lane t -----
        y_full = jnp.dot(hc_new[:, :HS].astype(jnp.bfloat16), wd,
                         preferred_element_type=jnp.float32)   # every lane == y_t
        y = jnp.where(lanet == t, y_full, y)
        return hc_new, y

    hc0 = jnp.zeros((bs, 2 * HS), jnp.float32)
    y0 = jnp.zeros((bs, seq_pad), jnp.float32)
    _, y = lax.fori_loop(0, seq, step, (hc0, y0), unroll=min(8, seq))
    y_ref[...] = y                                   # single lane-dense store


def _round_up(n, m):
    return ((n + m - 1) // m) * m


@jax.jit
def rgcn_v0_forward(x, A, params):
    """x: (batch, seq, input_dim); A: (batch, batch). Returns (batch, seq, 1)."""
    bs, seq, in_dim = x.shape
    HS = params["W_graph_h"].shape[0]
    bs_p = _round_up(bs, 8)        # sublane padding
    seq_p = _round_up(seq, 128)    # lane-dense output slab
    in_p = _round_up(in_dim, 8)

    # ---- offline weight fusion / reordering (layout only, done once) --------
    def perm_gates(w):   # reorder 4*HS axis from [i, f, g, o] to [i, f, o, g]
        return jnp.concatenate(
            [w[..., :2 * HS], w[..., 3 * HS:4 * HS], w[..., 2 * HS:3 * HS]],
            axis=-1)

    wih = perm_gates(params["weight_ih"])                          # (in, 4HS)
    wih = jnp.pad(wih, ((0, in_p - in_dim), (0, 0))).astype(jnp.bfloat16)
    whh = perm_gates(params["weight_hh"]).astype(jnp.bfloat16)     # (HS, 4HS)
    b = perm_gates(params["bias"]).reshape(1, 4 * HS).astype(jnp.float32)

    z = jnp.zeros((HS, HS), jnp.float32)
    # block-diagonal graph weights: [h|c] @ Wg = [h@Wgh | c@Wgc]
    Wg = jnp.block([[params["W_graph_h"], z],
                    [z, params["W_graph_c"]]]).astype(jnp.bfloat16)     # (2HS,2HS)
    bg = jnp.concatenate([params["b_graph_h"],
                          params["b_graph_c"]]).reshape(1, 2 * HS)
    # fused update, rows ordered [h_cur; c_cur; h_graph; c_graph]
    Wu = jnp.block([[params["W_h_cur"], z],
                    [z, params["W_c_cur"]],
                    [params["W_h_prev"], z],
                    [z, params["W_c_prev"]]]).astype(jnp.bfloat16)      # (4HS,2HS)
    bu = jnp.concatenate([params["b_h"], params["b_c"]]).reshape(1, 2 * HS)

    # dense-head weight replicated across seq_p lanes -> lane-dense y per step
    wd = jnp.tile(params["w_dense"].astype(jnp.bfloat16), (1, seq_p))   # (HS,seq_p)

    # time-major x, sublane/lane padded, bf16 MXU feed
    x_tm = jnp.transpose(x, (1, 0, 2))
    x_tm = jnp.pad(x_tm, ((0, 0), (0, bs_p - bs), (0, in_p - in_dim)))
    x_tm = x_tm.astype(jnp.bfloat16)
    A_p = jnp.pad(A, ((0, bs_p - bs), (0, bs_p - bs))).astype(jnp.bfloat16)

    y = pl.pallas_call(
        functools.partial(_rgcn_kernel, HS, seq, seq_p),
        out_shape=jax.ShapeDtypeStruct((bs_p, seq_p), jnp.float32),
        compiler_params=pltpu.CompilerParams(vmem_limit_bytes=32 * 1024 * 1024),
    )(x_tm, A_p, wih, whh, b, Wg, bg, Wu, bu, wd)

    return y[:bs, :seq, None] + params["b_dense"]                  # (bs, seq, 1)


def rgcn_v0_reference(x, A, params):
    """Pure-JAX f32 mirror of the PyTorch forward, for correctness checking."""
    bs, seq, _ = x.shape
    HS = params["W_graph_h"].shape[0]
    h = jnp.zeros((bs, HS), jnp.float32)
    c = jnp.zeros((bs, HS), jnp.float32)
    hs = []
    for t in range(seq):
        x_t = x[:, t, :]
        gates = x_t @ params["weight_ih"] + h @ params["weight_hh"] + params["bias"]
        i_t = jax.nn.sigmoid(gates[:, :HS])
        f_t = jax.nn.sigmoid(gates[:, HS:2 * HS])
        g_t = jnp.tanh(gates[:, 2 * HS:3 * HS])
        o_t = jax.nn.sigmoid(gates[:, 3 * HS:])
        c_cur = f_t * c + i_t * g_t
        h_cur = o_t * jnp.tanh(c)
        h_g = jnp.tanh(A @ (h @ params["W_graph_h"] + params["b_graph_h"]))
        c_g = jnp.tanh(A @ (c @ params["W_graph_c"] + params["b_graph_c"]))
        h = jax.nn.sigmoid(h_cur @ params["W_h_cur"] + h_g @ params["W_h_prev"] + params["b_h"])
        c = jax.nn.sigmoid(c_cur @ params["W_c_cur"] + c_g @ params["W_c_prev"] + params["b_c"])
        hs.append(h)
    hseq = jnp.stack(hs, axis=1)  # (bs, seq, HS)
    return hseq @ params["w_dense"] + params["b_dense"]


def _xavier_uniform(key, shape):
    fan_in, fan_out = shape[0], shape[1]
    bound = math.sqrt(6.0 / (fan_in + fan_out))
    return jax.random.uniform(key, shape, jnp.float32, -bound, bound)


def init_params(key, input_dim, hidden_dim):
    HS = hidden_dim
    keys = jax.random.split(key, 12)
    return {
        "W_graph_h": _xavier_uniform(keys[0], (HS, HS)),
        "b_graph_h": jnp.zeros((HS,), jnp.float32),
        "W_graph_c": _xavier_uniform(keys[1], (HS, HS)),
        "b_graph_c": jnp.zeros((HS,), jnp.float32),
        "W_h_cur": _xavier_uniform(keys[2], (HS, HS)),
        "W_h_prev": _xavier_uniform(keys[3], (HS, HS)),
        "b_h": jnp.zeros((HS,), jnp.float32),
        "W_c_cur": _xavier_uniform(keys[4], (HS, HS)),
        "W_c_prev": _xavier_uniform(keys[5], (HS, HS)),
        "b_c": jnp.zeros((HS,), jnp.float32),
        "weight_ih": _xavier_uniform(keys[6], (input_dim, 4 * HS)),
        "weight_hh": _xavier_uniform(keys[7], (HS, 4 * HS)),
        "bias": jnp.zeros((4 * HS,), jnp.float32),
        # dense head (nn.Linear(hidden_dim, 1)); deterministic synthetic init
        "w_dense": _xavier_uniform(keys[8], (HS, 1)),
        "b_dense": jax.random.uniform(keys[9], (1,), jnp.float32, -0.1, 0.1),
    }


if __name__ == "__main__":
    key = jax.random.PRNGKey(0)
    bs, seq, input_dim, hidden_dim = 8, 8, 4, 32  # bs = number of graph nodes/segments

    k_x, k_a, k_p = jax.random.split(key, 3)
    x = jax.random.normal(k_x, (bs, seq, input_dim), jnp.float32)
    # row-normalized random adjacency / distance matrix
    A_raw = jax.random.uniform(k_a, (bs, bs), jnp.float32)
    A = A_raw / jnp.sum(A_raw, axis=1, keepdims=True)

    params = init_params(k_p, input_dim, hidden_dim)

    out = rgcn_v0_forward(x, A, params)
    out = jax.block_until_ready(out)

    ref = rgcn_v0_reference(x, A, params)
    assert out.shape == (bs, seq, 1), out.shape
    # Tolerance deliberately relaxed from 1e-4: the kernel feeds the MXU bf16
    # operands (with f32 accumulation) per the perf review.  Typical max-abs
    # error is O(1e-3); 3e-2 still catches any structural / gate-permutation /
    # weight-fusion bug (those produce O(1e-1) errors).
    assert jnp.allclose(out, ref, rtol=3e-2, atol=3e-2), \
        float(jnp.max(jnp.abs(out - ref)))

    print("KERNEL_OK")
</pallas_src>

<mosaic_0001>
module attributes {stable_mosaic.version = 11 : i64} {
  func.func @_rgcn_kernel(%arg0: memref<8x8x8xbf16, #tpu.memory_space<vmem>>, %arg1: memref<8x8xbf16, #tpu.memory_space<vmem>>, %arg2: memref<8x128xbf16, #tpu.memory_space<vmem>>, %arg3: memref<32x128xbf16, #tpu.memory_space<vmem>>, %arg4: memref<1x128xf32, #tpu.memory_space<vmem>>, %arg5: memref<64x64xbf16, #tpu.memory_space<vmem>>, %arg6: memref<1x64xf32, #tpu.memory_space<vmem>>, %arg7: memref<128x64xbf16, #tpu.memory_space<vmem>>, %arg8: memref<1x64xf32, #tpu.memory_space<vmem>>, %arg9: memref<32x128xbf16, #tpu.memory_space<vmem>>, %arg10: memref<8x128xf32, #tpu.memory_space<vmem>>) attributes {dimension_semantics = [], scalar_prefetch = 0 : i64, scratch_operands = 0 : i64, tpu.core_type = #tpu.core_type<tc>} {
    %c0 = arith.constant 0 : index
    %c0_0 = arith.constant 0 : index
    %0 = vector.load %arg1[%c0, %c0_0] : memref<8x8xbf16, #tpu.memory_space<vmem>>, vector<8x8xbf16>
    %c0_1 = arith.constant 0 : index
    %c0_2 = arith.constant 0 : index
    %1 = vector.load %arg2[%c0_1, %c0_2] : memref<8x128xbf16, #tpu.memory_space<vmem>>, vector<8x128xbf16>
    %c0_3 = arith.constant 0 : index
    %c0_4 = arith.constant 0 : index
    %2 = vector.load %arg3[%c0_3, %c0_4] : memref<32x128xbf16, #tpu.memory_space<vmem>>, vector<32x128xbf16>
    %c0_5 = arith.constant 0 : index
    %c0_6 = arith.constant 0 : index
    %3 = vector.load %arg4[%c0_5, %c0_6] : memref<1x128xf32, #tpu.memory_space<vmem>>, vector<1x128xf32>
    %c0_7 = arith.constant 0 : index
    %c0_8 = arith.constant 0 : index
    %4 = vector.load %arg5[%c0_7, %c0_8] : memref<64x64xbf16, #tpu.memory_space<vmem>>, vector<64x64xbf16>
    %c0_9 = arith.constant 0 : index
    %c0_10 = arith.constant 0 : index
    %5 = vector.load %arg6[%c0_9, %c0_10] : memref<1x64xf32, #tpu.memory_space<vmem>>, vector<1x64xf32>
    %c0_11 = arith.constant 0 : index
    %c0_12 = arith.constant 0 : index
    %6 = vector.load %arg7[%c0_11, %c0_12] : memref<128x64xbf16, #tpu.memory_space<vmem>>, vector<128x64xbf16>
    %c0_13 = arith.constant 0 : index
    %c0_14 = arith.constant 0 : index
    %7 = vector.load %arg8[%c0_13, %c0_14] : memref<1x64xf32, #tpu.memory_space<vmem>>, vector<1x64xf32>
    %c0_15 = arith.constant 0 : index
    %c0_16 = arith.constant 0 : index
    %8 = vector.load %arg9[%c0_15, %c0_16] : memref<32x128xbf16, #tpu.memory_space<vmem>>, vector<32x128xbf16>
    %9 = tpu.iota {dimensions = array<i32: 1>} : vector<8x128xi32>
    %10 = tpu.iota {dimensions = array<i32: 1>} : vector<8x128xi32>
    %cst = arith.constant 0.000000e+00 : f32
    %11 = vector.broadcast %cst : f32 to vector<8x64xf32>
    %cst_17 = arith.constant 0.000000e+00 : f32
    %12 = vector.broadcast %cst_17 : f32 to vector<8x128xf32>
    %c0_i32 = arith.constant 0 : i32
    %13 = arith.truncf %11 : vector<8x64xf32> to vector<8x64xbf16>
    %14 = arith.index_cast %c0_i32 : i32 to index
    %c0_18 = arith.constant 0 : index
    %c0_19 = arith.constant 0 : index
    %15 = vector.load %arg0[%14, %c0_18, %c0_19] : memref<8x8x8xbf16, #tpu.memory_space<vmem>>, vector<1x8x8xbf16>
    %16 = vector.shape_cast %15 : vector<1x8x8xbf16> to vector<8x8xbf16>
    %cst_20 = arith.constant dense<0.000000e+00> : vector<8x128xf32>
    %17 = tpu.matmul %16, %1, %cst_20 {dimension_numbers = #tpu.dot_dimension_numbers<[1], [0], [0], [1], [0, 0, 1, 1], [], []>} : vector<8x8xbf16>, vector<8x128xbf16>, vector<8x128xf32> -> vector<8x128xf32>
    %18 = vector.extract_strided_slice %13 {offsets = [0, 0], sizes = [8, 32], strides = [1, 1]} : vector<8x64xbf16> to vector<8x32xbf16>
    %cst_21 = arith.constant dense<0.000000e+00> : vector<8x128xf32>
    %19 = tpu.matmul %18, %2, %cst_21 {dimension_numbers = #tpu.dot_dimension_numbers<[1], [0], [0], [1], [0, 0, 1, 1], [], []>} : vector<8x32xbf16>, vector<32x128xbf16>, vector<8x128xf32> -> vector<8x128xf32>
    %20 = arith.addf %17, %19 : vector<8x128xf32>
    %21 = vector.broadcast %3 : vector<1x128xf32> to vector<8x128xf32>
    %22 = arith.addf %20, %21 : vector<8x128xf32>
    %c96_i32 = arith.constant 96 : i32
    %23 = vector.broadcast %c96_i32 : i32 to vector<8x128xi32>
    %24 = arith.cmpi slt, %9, %23 : vector<8x128xi32>
    %25 = arith.negf %22 : vector<8x128xf32>
    %26 = math.exp %25 : vector<8x128xf32>
    %cst_22 = arith.constant 1.000000e+00 : f32
    %27 = vector.broadcast %cst_22 : f32 to vector<8x128xf32>
    %28 = arith.addf %27, %26 : vector<8x128xf32>
    %29 = arith.divf %27, %28 : vector<8x128xf32>
    %30 = math.tanh %22 : vector<8x128xf32>
    %31 = arith.select %24, %29, %30 : vector<8x128xi1>, vector<8x128xf32>
    %32 = vector.extract_strided_slice %31 {offsets = [0, 0], sizes = [8, 32], strides = [1, 1]} : vector<8x128xf32> to vector<8x32xf32>
    %33 = vector.extract_strided_slice %31 {offsets = [0, 32], sizes = [8, 32], strides = [1, 1]} : vector<8x128xf32> to vector<8x32xf32>
    %34 = vector.extract_strided_slice %31 {offsets = [0, 64], sizes = [8, 32], strides = [1, 1]} : vector<8x128xf32> to vector<8x32xf32>
    %35 = vector.extract_strided_slice %31 {offsets = [0, 96], sizes = [8, 32], strides = [1, 1]} : vector<8x128xf32> to vector<8x32xf32>
    %36 = vector.extract_strided_slice %11 {offsets = [0, 32], sizes = [8, 32], strides = [1, 1]} : vector<8x64xf32> to vector<8x32xf32>
    %37 = arith.mulf %33, %36 : vector<8x32xf32>
    %38 = arith.mulf %32, %35 : vector<8x32xf32>
    %39 = arith.addf %37, %38 : vector<8x32xf32>
    %40 = math.tanh %36 : vector<8x32xf32>
    %41 = arith.mulf %34, %40 : vector<8x32xf32>
    %cst_23 = arith.constant dense<0.000000e+00> : vector<8x64xf32>
    %42 = tpu.matmul %13, %4, %cst_23 {dimension_numbers = #tpu.dot_dimension_numbers<[1], [0], [0], [1], [0, 0, 1, 1], [], []>} : vector<8x64xbf16>, vector<64x64xbf16>, vector<8x64xf32> -> vector<8x64xf32>
    %43 = vector.broadcast %5 : vector<1x64xf32> to vector<8x64xf32>
    %44 = arith.addf %42, %43 : vector<8x64xf32>
    %45 = arith.truncf %44 : vector<8x64xf32> to vector<8x64xbf16>
    %cst_24 = arith.constant dense<0.000000e+00> : vector<8x64xf32>
    %46 = tpu.matmul %0, %45, %cst_24 {dimension_numbers = #tpu.dot_dimension_numbers<[1], [0], [0], [1], [0, 0, 1, 1], [], []>} : vector<8x8xbf16>, vector<8x64xbf16>, vector<8x64xf32> -> vector<8x64xf32>
    %47 = math.tanh %46 : vector<8x64xf32>
    %48 = tpu.concatenate %41, %39, %47 in 1 : vector<8x32xf32>, vector<8x32xf32>, vector<8x64xf32> -> vector<8x128xf32>
    %49 = arith.truncf %48 : vector<8x128xf32> to vector<8x128xbf16>
    %cst_25 = arith.constant dense<0.000000e+00> : vector<8x64xf32>
    %50 = tpu.matmul %49, %6, %cst_25 {dimension_numbers = #tpu.dot_dimension_numbers<[1], [0], [0], [1], [0, 0, 1, 1], [], []>} : vector<8x128xbf16>, vector<128x64xbf16>, vector<8x64xf32> -> vector<8x64xf32>
    %51 = vector.broadcast %7 : vector<1x64xf32> to vector<8x64xf32>
    %52 = arith.addf %50, %51 : vector<8x64xf32>
    %53 = arith.negf %52 : vector<8x64xf32>
    %54 = math.exp %53 : vector<8x64xf32>
    %cst_26 = arith.constant 1.000000e+00 : f32
    %55 = vector.broadcast %cst_26 : f32 to vector<8x64xf32>
    %56 = arith.addf %55, %54 : vector<8x64xf32>
    %57 = arith.divf %55, %56 : vector<8x64xf32>
    %58 = vector.extract_strided_slice %57 {offsets = [0, 0], sizes = [8, 32], strides = [1, 1]} : vector<8x64xf32> to vector<8x32xf32>
    %59 = arith.truncf %58 : vector<8x32xf32> to vector<8x32xbf16>
    %cst_27 = arith.constant dense<0.000000e+00> : vector<8x128xf32>
    %60 = tpu.matmul %59, %8, %cst_27 {dimension_numbers = #tpu.dot_dimension_numbers<[1], [0], [0], [1], [0, 0, 1, 1], [], []>} : vector<8x32xbf16>, vector<32x128xbf16>, vector<8x128xf32> -> vector<8x128xf32>
    %61 = vector.broadcast %c0_i32 : i32 to vector<8x128xi32>
    %62 = arith.cmpi eq, %10, %61 : vector<8x128xi32>
    %63 = arith.select %62, %60, %12 : vector<8x128xi1>, vector<8x128xf32>
    %c1_i32 = arith.constant 1 : i32
    %64 = arith.truncf %57 : vector<8x64xf32> to vector<8x64xbf16>
    %65 = arith.index_cast %c1_i32 : i32 to index
    %c0_28 = arith.constant 0 : index
    %c0_29 = arith.constant 0 : index
    %66 = vector.load %arg0[%65, %c0_28, %c0_29] : memref<8x8x8xbf16, #tpu.memory_space<vmem>>, vector<1x8x8xbf16>
    %67 = vector.shape_cast %66 : vector<1x8x8xbf16> to vector<8x8xbf16>
    %cst_30 = arith.constant dense<0.000000e+00> : vector<8x128xf32>
    %68 = tpu.matmul %67, %1, %cst_30 {dimension_numbers = #tpu.dot_dimension_numbers<[1], [0], [0], [1], [0, 0, 1, 1], [], []>} : vector<8x8xbf16>, vector<8x128xbf16>, vector<8x128xf32> -> vector<8x128xf32>
    %69 = vector.extract_strided_slice %64 {offsets = [0, 0], sizes = [8, 32], strides = [1, 1]} : vector<8x64xbf16> to vector<8x32xbf16>
    %cst_31 = arith.constant dense<0.000000e+00> : vector<8x128xf32>
    %70 = tpu.matmul %69, %2, %cst_31 {dimension_numbers = #tpu.dot_dimension_numbers<[1], [0], [0], [1], [0, 0, 1, 1], [], []>} : vector<8x32xbf16>, vector<32x128xbf16>, vector<8x128xf32> -> vector<8x128xf32>
    %71 = arith.addf %68, %70 : vector<8x128xf32>
    %72 = vector.broadcast %3 : vector<1x128xf32> to vector<8x128xf32>
    %73 = arith.addf %71, %72 : vector<8x128xf32>
    %c96_i32_32 = arith.constant 96 : i32
    %74 = vector.broadcast %c96_i32_32 : i32 to vector<8x128xi32>
    %75 = arith.cmpi slt, %9, %74 : vector<8x128xi32>
    %76 = arith.negf %73 : vector<8x128xf32>
    %77 = math.exp %76 : vector<8x128xf32>
    %cst_33 = arith.constant 1.000000e+00 : f32
    %78 = vector.broadcast %cst_33 : f32 to vector<8x128xf32>
    %79 = arith.addf %78, %77 : vector<8x128xf32>
    %80 = arith.divf %78, %79 : vector<8x128xf32>
    %81 = math.tanh %73 : vector<8x128xf32>
    %82 = arith.select %75, %80, %81 : vector<8x128xi1>, vector<8x128xf32>
    %83 = vector.extract_strided_slice %82 {offsets = [0, 0], sizes = [8, 32], strides = [1, 1]} : vector<8x128xf32> to vector<8x32xf32>
    %84 = vector.extract_strided_slice %82 {offsets = [0, 32], sizes = [8, 32], strides = [1, 1]} : vector<8x128xf32> to vector<8x32xf32>
    %85 = vector.extract_strided_slice %82 {offsets = [0, 64], sizes = [8, 32], strides = [1, 1]} : vector<8x128xf32> to vector<8x32xf32>
    %86 = vector.extract_strided_slice %82 {offsets = [0, 96], sizes = [8, 32], strides = [1, 1]} : vector<8x128xf32> to vector<8x32xf32>
    %87 = vector.extract_strided_slice %57 {offsets = [0, 32], sizes = [8, 32], strides = [1, 1]} : vector<8x64xf32> to vector<8x32xf32>
    %88 = arith.mulf %84, %87 : vector<8x32xf32>
    %89 = arith.mulf %83, %86 : vector<8x32xf32>
    %90 = arith.addf %88, %89 : vector<8x32xf32>
    %91 = math.tanh %87 : vector<8x32xf32>
    %92 = arith.mulf %85, %91 : vector<8x32xf32>
    %cst_34 = arith.constant dense<0.000000e+00> : vector<8x64xf32>
    %93 = tpu.matmul %64, %4, %cst_34 {dimension_numbers = #tpu.dot_dimension_numbers<[1], [0], [0], [1], [0, 0, 1, 1], [], []>} : vector<8x64xbf16>, vector<64x64xbf16>, vector<8x64xf32> -> vector<8x64xf32>
    %94 = vector.broadcast %5 : vector<1x64xf32> to vector<8x64xf32>
    %95 = arith.addf %93, %94 : vector<8x64xf32>
    %96 = arith.truncf %95 : vector<8x64xf32> to vector<8x64xbf16>
    %cst_35 = arith.constant dense<0.000000e+00> : vector<8x64xf32>
    %97 = tpu.matmul %0, %96, %cst_35 {dimension_numbers = #tpu.dot_dimension_numbers<[1], [0], [0], [1], [0, 0, 1, 1], [], []>} : vector<8x8xbf16>, vector<8x64xbf16>, vector<8x64xf32> -> vector<8x64xf32>
    %98 = math.tanh %97 : vector<8x64xf32>
    %99 = tpu.concatenate %92, %90, %98 in 1 : vector<8x32xf32>, vector<8x32xf32>, vector<8x64xf32> -> vector<8x128xf32>
    %100 = arith.truncf %99 : vector<8x128xf32> to vector<8x128xbf16>
    %cst_36 = arith.constant dense<0.000000e+00> : vector<8x64xf32>
    %101 = tpu.matmul %100, %6, %cst_36 {dimension_numbers = #tpu.dot_dimension_numbers<[1], [0], [0], [1], [0, 0, 1, 1], [], []>} : vector<8x128xbf16>, vector<128x64xbf16>, vector<8x64xf32> -> vector<8x64xf32>
    %102 = vector.broadcast %7 : vector<1x64xf32> to vector<8x64xf32>
    %103 = arith.addf %101, %102 : vector<8x64xf32>
    %104 = arith.negf %103 : vector<8x64xf32>
    %105 = math.exp %104 : vector<8x64xf32>
    %cst_37 = arith.constant 1.000000e+00 : f32
    %106 = vector.broadcast %cst_37 : f32 to vector<8x64xf32>
    %107 = arith.addf %106, %105 : vector<8x64xf32>
    %108 = arith.divf %106, %107 : vector<8x64xf32>
    %109 = vector.extract_strided_slice %108 {offsets = [0, 0], sizes = [8, 32], strides = [1, 1]} : vector<8x64xf32> to vector<8x32xf32>
    %110 = arith.truncf %109 : vector<8x32xf32> to vector<8x32xbf16>
    %cst_38 = arith.constant dense<0.000000e+00> : vector<8x128xf32>
    %111 = tpu.matmul %110, %8, %cst_38 {dimension_numbers = #tpu.dot_dimension_numbers<[1], [0], [0], [1], [0, 0, 1, 1], [], []>} : vector<8x32xbf16>, vector<32x128xbf16>, vector<8x128xf32> -> vector<8x128xf32>
    %112 = vector.broadcast %c1_i32 : i32 to vector<8x128xi32>
    %113 = arith.cmpi eq, %10, %112 : vector<8x128xi32>
    %114 = arith.select %113, %111, %63 : vector<8x128xi1>, vector<8x128xf32>
    %c2_i32 = arith.constant 2 : i32
    %115 = arith.truncf %108 : vector<8x64xf32> to vector<8x64xbf16>
    %116 = arith.index_cast %c2_i32 : i32 to index
    %c0_39 = arith.constant 0 : index
    %c0_40 = arith.constant 0 : index
    %117 = vector.load %arg0[%116, %c0_39, %c0_40] : memref<8x8x8xbf16, #tpu.memory_space<vmem>>, vector<1x8x8xbf16>
    %118 = vector.shape_cast %117 : vector<1x8x8xbf16> to vector<8x8xbf16>
    %cst_41 = arith.constant dense<0.000000e+00> : vector<8x128xf32>
    %119 = tpu.matmul %118, %1, %cst_41 {dimension_numbers = #tpu.dot_dimension_numbers<[1], [0], [0], [1], [0, 0, 1, 1], [], []>} : vector<8x8xbf16>, vector<8x128xbf16>, vector<8x128xf32> -> vector<8x128xf32>
    %120 = vector.extract_strided_slice %115 {offsets = [0, 0], sizes = [8, 32], strides = [1, 1]} : vector<8x64xbf16> to vector<8x32xbf16>
    %cst_42 = arith.constant dense<0.000000e+00> : vector<8x128xf32>
    %121 = tpu.matmul %120, %2, %cst_42 {dimension_numbers = #tpu.dot_dimension_numbers<[1], [0], [0], [1], [0, 0, 1, 1], [], []>} : vector<8x32xbf16>, vector<32x128xbf16>, vector<8x128xf32> -> vector<8x128xf32>
    %122 = arith.addf %119, %121 : vector<8x128xf32>
    %123 = vector.broadcast %3 : vector<1x128xf32> to vector<8x128xf32>
    %124 = arith.addf %122, %123 : vector<8x128xf32>
    %c96_i32_43 = arith.constant 96 : i32
    %125 = vector.broadcast %c96_i32_43 : i32 to vector<8x128xi32>
    %126 = arith.cmpi slt, %9, %125 : vector<8x128xi32>
    %127 = arith.negf %124 : vector<8x128xf32>
    %128 = math.exp %127 : vector<8x128xf32>
    %cst_44 = arith.constant 1.000000e+00 : f32
    %129 = vector.broadcast %cst_44 : f32 to vector<8x128xf32>
    %130 = arith.addf %129, %128 : vector<8x128xf32>
    %131 = arith.divf %129, %130 : vector<8x128xf32>
    %132 = math.tanh %124 : vector<8x128xf32>
    %133 = arith.select %126, %131, %132 : vector<8x128xi1>, vector<8x128xf32>
    %134 = vector.extract_strided_slice %133 {offsets = [0, 0], sizes = [8, 32], strides = [1, 1]} : vector<8x128xf32> to vector<8x32xf32>
    %135 = vector.extract_strided_slice %133 {offsets = [0, 32], sizes = [8, 32], strides = [1, 1]} : vector<8x128xf32> to vector<8x32xf32>
    %136 = vector.extract_strided_slice %133 {offsets = [0, 64], sizes = [8, 32], strides = [1, 1]} : vector<8x128xf32> to vector<8x32xf32>
    %137 = vector.extract_strided_slice %133 {offsets = [0, 96], sizes = [8, 32], strides = [1, 1]} : vector<8x128xf32> to vector<8x32xf32>
    %138 = vector.extract_strided_slice %108 {offsets = [0, 32], sizes = [8, 32], strides = [1, 1]} : vector<8x64xf32> to vector<8x32xf32>
    %139 = arith.mulf %135, %138 : vector<8x32xf32>
    %140 = arith.mulf %134, %137 : vector<8x32xf32>
    %141 = arith.addf %139, %140 : vector<8x32xf32>
    %142 = math.tanh %138 : vector<8x32xf32>
    %143 = arith.mulf %136, %142 : vector<8x32xf32>
    %cst_45 = arith.constant dense<0.000000e+00> : vector<8x64xf32>
    %144 = tpu.matmul %115, %4, %cst_45 {dimension_numbers = #tpu.dot_dimension_numbers<[1], [0], [0], [1], [0, 0, 1, 1], [], []>} : vector<8x64xbf16>, vector<64x64xbf16>, vector<8x64xf32> -> vector<8x64xf32>
    %145 = vector.broadcast %5 : vector<1x64xf32> to vector<8x64xf32>
    %146 = arith.addf %144, %145 : vector<8x64xf32>
    %147 = arith.truncf %146 : vector<8x64xf32> to vector<8x64xbf16>
    %cst_46 = arith.constant dense<0.000000e+00> : vector<8x64xf32>
    %148 = tpu.matmul %0, %147, %cst_46 {dimension_numbers = #tpu.dot_dimension_numbers<[1], [0], [0], [1], [0, 0, 1, 1], [], []>} : vector<8x8xbf16>, vector<8x64xbf16>, vector<8x64xf32> -> vector<8x64xf32>
    %149 = math.tanh %148 : vector<8x64xf32>
    %150 = tpu.concatenate %143, %141, %149 in 1 : vector<8x32xf32>, vector<8x32xf32>, vector<8x64xf32> -> vector<8x128xf32>
    %151 = arith.truncf %150 : vector<8x128xf32> to vector<8x128xbf16>
    %cst_47 = arith.constant dense<0.000000e+00> : vector<8x64xf32>
    %152 = tpu.matmul %151, %6, %cst_47 {dimension_numbers = #tpu.dot_dimension_numbers<[1], [0], [0], [1], [0, 0, 1, 1], [], []>} : vector<8x128xbf16>, vector<128x64xbf16>, vector<8x64xf32> -> vector<8x64xf32>
    %153 = vector.broadcast %7 : vector<1x64xf32> to vector<8x64xf32>
    %154 = arith.addf %152, %153 : vector<8x64xf32>
    %155 = arith.negf %154 : vector<8x64xf32>
    %156 = math.exp %155 : vector<8x64xf32>
    %cst_48 = arith.constant 1.000000e+00 : f32
    %157 = vector.broadcast %cst_48 : f32 to vector<8x64xf32>
    %158 = arith.addf %157, %156 : vector<8x64xf32>
    %159 = arith.divf %157, %158 : vector<8x64xf32>
    %160 = vector.extract_strided_slice %159 {offsets = [0, 0], sizes = [8, 32], strides = [1, 1]} : vector<8x64xf32> to vector<8x32xf32>
    %161 = arith.truncf %160 : vector<8x32xf32> to vector<8x32xbf16>
    %cst_49 = arith.constant dense<0.000000e+00> : vector<8x128xf32>
    %162 = tpu.matmul %161, %8, %cst_49 {dimension_numbers = #tpu.dot_dimension_numbers<[1], [0], [0], [1], [0, 0, 1, 1], [], []>} : vector<8x32xbf16>, vector<32x128xbf16>, vector<8x128xf32> -> vector<8x128xf32>
    %163 = vector.broadcast %c2_i32 : i32 to vector<8x128xi32>
    %164 = arith.cmpi eq, %10, %163 : vector<8x128xi32>
    %165 = arith.select %164, %162, %114 : vector<8x128xi1>, vector<8x128xf32>
    %c3_i32 = arith.constant 3 : i32
    %166 = arith.truncf %159 : vector<8x64xf32> to vector<8x64xbf16>
    %167 = arith.index_cast %c3_i32 : i32 to index
    %c0_50 = arith.constant 0 : index
    %c0_51 = arith.constant 0 : index
    %168 = vector.load %arg0[%167, %c0_50, %c0_51] : memref<8x8x8xbf16, #tpu.memory_space<vmem>>, vector<1x8x8xbf16>
    %169 = vector.shape_cast %168 : vector<1x8x8xbf16> to vector<8x8xbf16>
    %cst_52 = arith.constant dense<0.000000e+00> : vector<8x128xf32>
    %170 = tpu.matmul %169, %1, %cst_52 {dimension_numbers = #tpu.dot_dimension_numbers<[1], [0], [0], [1], [0, 0, 1, 1], [], []>} : vector<8x8xbf16>, vector<8x128xbf16>, vector<8x128xf32> -> vector<8x128xf32>
    %171 = vector.extract_strided_slice %166 {offsets = [0, 0], sizes = [8, 32], strides = [1, 1]} : vector<8x64xbf16> to vector<8x32xbf16>
    %cst_53 = arith.constant dense<0.000000e+00> : vector<8x128xf32>
    %172 = tpu.matmul %171, %2, %cst_53 {dimension_numbers = #tpu.dot_dimension_numbers<[1], [0], [0], [1], [0, 0, 1, 1], [], []>} : vector<8x32xbf16>, vector<32x128xbf16>, vector<8x128xf32> -> vector<8x128xf32>
    %173 = arith.addf %170, %172 : vector<8x128xf32>
    %174 = vector.broadcast %3 : vector<1x128xf32> to vector<8x128xf32>
    %175 = arith.addf %173, %174 : vector<8x128xf32>
    %c96_i32_54 = arith.constant 96 : i32
    %176 = vector.broadcast %c96_i32_54 : i32 to vector<8x128xi32>
    %177 = arith.cmpi slt, %9, %176 : vector<8x128xi32>
    %178 = arith.negf %175 : vector<8x128xf32>
    %179 = math.exp %178 : vector<8x128xf32>
    %cst_55 = arith.constant 1.000000e+00 : f32
    %180 = vector.broadcast %cst_55 : f32 to vector<8x128xf32>
    %181 = arith.addf %180, %179 : vector<8x128xf32>
    %182 = arith.divf %180, %181 : vector<8x128xf32>
    %183 = math.tanh %175 : vector<8x128xf32>
    %184 = arith.select %177, %182, %183 : vector<8x128xi1>, vector<8x128xf32>
    %185 = vector.extract_strided_slice %184 {offsets = [0, 0], sizes = [8, 32], strides = [1, 1]} : vector<8x128xf32> to vector<8x32xf32>
    %186 = vector.extract_strided_slice %184 {offsets = [0, 32], sizes = [8, 32], strides = [1, 1]} : vector<8x128xf32> to vector<8x32xf32>
    %187 = vector.extract_strided_slice %184 {offsets = [0, 64], sizes = [8, 32], strides = [1, 1]} : vector<8x128xf32> to vector<8x32xf32>
    %188 = vector.extract_strided_slice %184 {offsets = [0, 96], sizes = [8, 32], strides = [1, 1]} : vector<8x128xf32> to vector<8x32xf32>
    %189 = vector.extract_strided_slice %159 {offsets = [0, 32], sizes = [8, 32], strides = [1, 1]} : vector<8x64xf32> to vector<8x32xf32>
    %190 = arith.mulf %186, %189 : vector<8x32xf32>
    %191 = arith.mulf %185, %188 : vector<8x32xf32>
    %192 = arith.addf %190, %191 : vector<8x32xf32>
    %193 = math.tanh %189 : vector<8x32xf32>
    %194 = arith.mulf %187, %193 : vector<8x32xf32>
    %cst_56 = arith.constant dense<0.000000e+00> : vector<8x64xf32>
    %195 = tpu.matmul %166, %4, %cst_56 {dimension_numbers = #tpu.dot_dimension_numbers<[1], [0], [0], [1], [0, 0, 1, 1], [], []>} : vector<8x64xbf16>, vector<64x64xbf16>, vector<8x64xf32> -> vector<8x64xf32>
    %196 = vector.broadcast %5 : vector<1x64xf32> to vector<8x64xf32>
    %197 = arith.addf %195, %196 : vector<8x64xf32>
    %198 = arith.truncf %197 : vector<8x64xf32> to vector<8x64xbf16>
    %cst_57 = arith.constant dense<0.000000e+00> : vector<8x64xf32>
    %199 = tpu.matmul %0, %198, %cst_57 {dimension_numbers = #tpu.dot_dimension_numbers<[1], [0], [0], [1], [0, 0, 1, 1], [], []>} : vector<8x8xbf16>, vector<8x64xbf16>, vector<8x64xf32> -> vector<8x64xf32>
    %200 = math.tanh %199 : vector<8x64xf32>
    %201 = tpu.concatenate %194, %192, %200 in 1 : vector<8x32xf32>, vector<8x32xf32>, vector<8x64xf32> -> vector<8x128xf32>
    %202 = arith.truncf %201 : vector<8x128xf32> to vector<8x128xbf16>
    %cst_58 = arith.constant dense<0.000000e+00> : vector<8x64xf32>
    %203 = tpu.matmul %202, %6, %cst_58 {dimension_numbers = #tpu.dot_dimension_numbers<[1], [0], [0], [1], [0, 0, 1, 1], [], []>} : vector<8x128xbf16>, vector<128x64xbf16>, vector<8x64xf32> -> vector<8x64xf32>
    %204 = vector.broadcast %7 : vector<1x64xf32> to vector<8x64xf32>
    %205 = arith.addf %203, %204 : vector<8x64xf32>
    %206 = arith.negf %205 : vector<8x64xf32>
    %207 = math.exp %206 : vector<8x64xf32>
    %cst_59 = arith.constant 1.000000e+00 : f32
    %208 = vector.broadcast %cst_59 : f32 to vector<8x64xf32>
    %209 = arith.addf %208, %207 : vector<8x64xf32>
    %210 = arith.divf %208, %209 : vector<8x64xf32>
    %211 = vector.extract_strided_slice %210 {offsets = [0, 0], sizes = [8, 32], strides = [1, 1]} : vector<8x64xf32> to vector<8x32xf32>
    %212 = arith.truncf %211 : vector<8x32xf32> to vector<8x32xbf16>
    %cst_60 = arith.constant dense<0.000000e+00> : vector<8x128xf32>
    %213 = tpu.matmul %212, %8, %cst_60 {dimension_numbers = #tpu.dot_dimension_numbers<[1], [0], [0], [1], [0, 0, 1, 1], [], []>} : vector<8x32xbf16>, vector<32x128xbf16>, vector<8x128xf32> -> vector<8x128xf32>
    %214 = vector.broadcast %c3_i32 : i32 to vector<8x128xi32>
    %215 = arith.cmpi eq, %10, %214 : vector<8x128xi32>
    %216 = arith.select %215, %213, %165 : vector<8x128xi1>, vector<8x128xf32>
    %c4_i32 = arith.constant 4 : i32
    %217 = arith.truncf %210 : vector<8x64xf32> to vector<8x64xbf16>
    %218 = arith.index_cast %c4_i32 : i32 to index
    %c0_61 = arith.constant 0 : index
    %c0_62 = arith.constant 0 : index
    %219 = vector.load %arg0[%218, %c0_61, %c0_62] : memref<8x8x8xbf16, #tpu.memory_space<vmem>>, vector<1x8x8xbf16>
    %220 = vector.shape_cast %219 : vector<1x8x8xbf16> to vector<8x8xbf16>
    %cst_63 = arith.constant dense<0.000000e+00> : vector<8x128xf32>
    %221 = tpu.matmul %220, %1, %cst_63 {dimension_numbers = #tpu.dot_dimension_numbers<[1], [0], [0], [1], [0, 0, 1, 1], [], []>} : vector<8x8xbf16>, vector<8x128xbf16>, vector<8x128xf32> -> vector<8x128xf32>
    %222 = vector.extract_strided_slice %217 {offsets = [0, 0], sizes = [8, 32], strides = [1, 1]} : vector<8x64xbf16> to vector<8x32xbf16>
    %cst_64 = arith.constant dense<0.000000e+00> : vector<8x128xf32>
    %223 = tpu.matmul %222, %2, %cst_64 {dimension_numbers = #tpu.dot_dimension_numbers<[1], [0], [0], [1], [0, 0, 1, 1], [], []>} : vector<8x32xbf16>, vector<32x128xbf16>, vector<8x128xf32> -> vector<8x128xf32>
    %224 = arith.addf %221, %223 : vector<8x128xf32>
    %225 = vector.broadcast %3 : vector<1x128xf32> to vector<8x128xf32>
    %226 = arith.addf %224, %225 : vector<8x128xf32>
    %c96_i32_65 = arith.constant 96 : i32
    %227 = vector.broadcast %c96_i32_65 : i32 to vector<8x128xi32>
    %228 = arith.cmpi slt, %9, %227 : vector<8x128xi32>
    %229 = arith.negf %226 : vector<8x128xf32>
    %230 = math.exp %229 : vector<8x128xf32>
    %cst_66 = arith.constant 1.000000e+00 : f32
    %231 = vector.broadcast %cst_66 : f32 to vector<8x128xf32>
    %232 = arith.addf %231, %230 : vector<8x128xf32>
    %233 = arith.divf %231, %232 : vector<8x128xf32>
    %234 = math.tanh %226 : vector<8x128xf32>
    %235 = arith.select %228, %233, %234 : vector<8x128xi1>, vector<8x128xf32>
    %236 = vector.extract_strided_slice %235 {offsets = [0, 0], sizes = [8, 32], strides = [1, 1]} : vector<8x128xf32> to vector<8x32xf32>
    %237 = vector.extract_strided_slice %235 {offsets = [0, 32], sizes = [8, 32], strides = [1, 1]} : vector<8x128xf32> to vector<8x32xf32>
    %238 = vector.extract_strided_slice %235 {offsets = [0, 64], sizes = [8, 32], strides = [1, 1]} : vector<8x128xf32> to vector<8x32xf32>
    %239 = vector.extract_strided_slice %235 {offsets = [0, 96], sizes = [8, 32], strides = [1, 1]} : vector<8x128xf32> to vector<8x32xf32>
    %240 = vector.extract_strided_slice %210 {offsets = [0, 32], sizes = [8, 32], strides = [1, 1]} : vector<8x64xf32> to vector<8x32xf32>
    %241 = arith.mulf %237, %240 : vector<8x32xf32>
    %242 = arith.mulf %236, %239 : vector<8x32xf32>
    %243 = arith.addf %241, %242 : vector<8x32xf32>
    %244 = math.tanh %240 : vector<8x32xf32>
    %245 = arith.mulf %238, %244 : vector<8x32xf32>
    %cst_67 = arith.constant dense<0.000000e+00> : vector<8x64xf32>
    %246 = tpu.matmul %217, %4, %cst_67 {dimension_numbers = #tpu.dot_dimension_numbers<[1], [0], [0], [1], [0, 0, 1, 1], [], []>} : vector<8x64xbf16>, vector<64x64xbf16>, vector<8x64xf32> -> vector<8x64xf32>
    %247 = vector.broadcast %5 : vector<1x64xf32> to vector<8x64xf32>
    %248 = arith.addf %246, %247 : vector<8x64xf32>
    %249 = arith.truncf %248 : vector<8x64xf32> to vector<8x64xbf16>
    %cst_68 = arith.constant dense<0.000000e+00> : vector<8x64xf32>
    %250 = tpu.matmul %0, %249, %cst_68 {dimension_numbers = #tpu.dot_dimension_numbers<[1], [0], [0], [1], [0, 0, 1, 1], [], []>} : vector<8x8xbf16>, vector<8x64xbf16>, vector<8x64xf32> -> vector<8x64xf32>
    %251 = math.tanh %250 : vector<8x64xf32>
    %252 = tpu.concatenate %245, %243, %251 in 1 : vector<8x32xf32>, vector<8x32xf32>, vector<8x64xf32> -> vector<8x128xf32>
    %253 = arith.truncf %252 : vector<8x128xf32> to vector<8x128xbf16>
    %cst_69 = arith.constant dense<0.000000e+00> : vector<8x64xf32>
    %254 = tpu.matmul %253, %6, %cst_69 {dimension_numbers = #tpu.dot_dimension_numbers<[1], [0], [0], [1], [0, 0, 1, 1], [], []>} : vector<8x128xbf16>, vector<128x64xbf16>, vector<8x64xf32> -> vector<8x64xf32>
    %255 = vector.broadcast %7 : vector<1x64xf32> to vector<8x64xf32>
    %256 = arith.addf %254, %255 : vector<8x64xf32>
    %257 = arith.negf %256 : vector<8x64xf32>
    %258 = math.exp %257 : vector<8x64xf32>
    %cst_70 = arith.constant 1.000000e+00 : f32
    %259 = vector.broadcast %cst_70 : f32 to vector<8x64xf32>
    %260 = arith.addf %259, %258 : vector<8x64xf32>
    %261 = arith.divf %259, %260 : vector<8x64xf32>
    %262 = vector.extract_strided_slice %261 {offsets = [0, 0], sizes = [8, 32], strides = [1, 1]} : vector<8x64xf32> to vector<8x32xf32>
    %263 = arith.truncf %262 : vector<8x32xf32> to vector<8x32xbf16>
    %cst_71 = arith.constant dense<0.000000e+00> : vector<8x128xf32>
    %264 = tpu.matmul %263, %8, %cst_71 {dimension_numbers = #tpu.dot_dimension_numbers<[1], [0], [0], [1], [0, 0, 1, 1], [], []>} : vector<8x32xbf16>, vector<32x128xbf16>, vector<8x128xf32> -> vector<8x128xf32>
    %265 = vector.broadcast %c4_i32 : i32 to vector<8x128xi32>
    %266 = arith.cmpi eq, %10, %265 : vector<8x128xi32>
    %267 = arith.select %266, %264, %216 : vector<8x128xi1>, vector<8x128xf32>
    %c5_i32 = arith.constant 5 : i32
    %268 = arith.truncf %261 : vector<8x64xf32> to vector<8x64xbf16>
    %269 = arith.index_cast %c5_i32 : i32 to index
    %c0_72 = arith.constant 0 : index
    %c0_73 = arith.constant 0 : index
    %270 = vector.load %arg0[%269, %c0_72, %c0_73] : memref<8x8x8xbf16, #tpu.memory_space<vmem>>, vector<1x8x8xbf16>
    %271 = vector.shape_cast %270 : vector<1x8x8xbf16> to vector<8x8xbf16>
    %cst_74 = arith.constant dense<0.000000e+00> : vector<8x128xf32>
    %272 = tpu.matmul %271, %1, %cst_74 {dimension_numbers = #tpu.dot_dimension_numbers<[1], [0], [0], [1], [0, 0, 1, 1], [], []>} : vector<8x8xbf16>, vector<8x128xbf16>, vector<8x128xf32> -> vector<8x128xf32>
    %273 = vector.extract_strided_slice %268 {offsets = [0, 0], sizes = [8, 32], strides = [1, 1]} : vector<8x64xbf16> to vector<8x32xbf16>
    %cst_75 = arith.constant dense<0.000000e+00> : vector<8x128xf32>
    %274 = tpu.matmul %273, %2, %cst_75 {dimension_numbers = #tpu.dot_dimension_numbers<[1], [0], [0], [1], [0, 0, 1, 1], [], []>} : vector<8x32xbf16>, vector<32x128xbf16>, vector<8x128xf32> -> vector<8x128xf32>
    %275 = arith.addf %272, %274 : vector<8x128xf32>
    %276 = vector.broadcast %3 : vector<1x128xf32> to vector<8x128xf32>
    %277 = arith.addf %275, %276 : vector<8x128xf32>
    %c96_i32_76 = arith.constant 96 : i32
    %278 = vector.broadcast %c96_i32_76 : i32 to vector<8x128xi32>
    %279 = arith.cmpi slt, %9, %278 : vector<8x128xi32>
    %280 = arith.negf %277 : vector<8x128xf32>
    %281 = math.exp %280 : vector<8x128xf32>
    %cst_77 = arith.constant 1.000000e+00 : f32
    %282 = vector.broadcast %cst_77 : f32 to vector<8x128xf32>
    %283 = arith.addf %282, %281 : vector<8x128xf32>
    %284 = arith.divf %282, %283 : vector<8x128xf32>
    %285 = math.tanh %277 : vector<8x128xf32>
    %286 = arith.select %279, %284, %285 : vector<8x128xi1>, vector<8x128xf32>
    %287 = vector.extract_strided_slice %286 {offsets = [0, 0], sizes = [8, 32], strides = [1, 1]} : vector<8x128xf32> to vector<8x32xf32>
    %288 = vector.extract_strided_slice %286 {offsets = [0, 32], sizes = [8, 32], strides = [1, 1]} : vector<8x128xf32> to vector<8x32xf32>
    %289 = vector.extract_strided_slice %286 {offsets = [0, 64], sizes = [8, 32], strides = [1, 1]} : vector<8x128xf32> to vector<8x32xf32>
    %290 = vector.extract_strided_slice %286 {offsets = [0, 96], sizes = [8, 32], strides = [1, 1]} : vector<8x128xf32> to vector<8x32xf32>
    %291 = vector.extract_strided_slice %261 {offsets = [0, 32], sizes = [8, 32], strides = [1, 1]} : vector<8x64xf32> to vector<8x32xf32>
    %292 = arith.mulf %288, %291 : vector<8x32xf32>
    %293 = arith.mulf %287, %290 : vector<8x32xf32>
    %294 = arith.addf %292, %293 : vector<8x32xf32>
    %295 = math.tanh %291 : vector<8x32xf32>
    %296 = arith.mulf %289, %295 : vector<8x32xf32>
    %cst_78 = arith.constant dense<0.000000e+00> : vector<8x64xf32>
    %297 = tpu.matmul %268, %4, %cst_78 {dimension_numbers = #tpu.dot_dimension_numbers<[1], [0], [0], [1], [0, 0, 1, 1], [], []>} : vector<8x64xbf16>, vector<64x64xbf16>, vector<8x64xf32> -> vector<8x64xf32>
    %298 = vector.broadcast %5 : vector<1x64xf32> to vector<8x64xf32>
    %299 = arith.addf %297, %298 : vector<8x64xf32>
    %300 = arith.truncf %299 : vector<8x64xf32> to vector<8x64xbf16>
    %cst_79 = arith.constant dense<0.000000e+00> : vector<8x64xf32>
    %301 = tpu.matmul %0, %300, %cst_79 {dimension_numbers = #tpu.dot_dimension_numbers<[1], [0], [0], [1], [0, 0, 1, 1], [], []>} : vector<8x8xbf16>, vector<8x64xbf16>, vector<8x64xf32> -> vector<8x64xf32>
    %302 = math.tanh %301 : vector<8x64xf32>
    %303 = tpu.concatenate %296, %294, %302 in 1 : vector<8x32xf32>, vector<8x32xf32>, vector<8x64xf32> -> vector<8x128xf32>
    %304 = arith.truncf %303 : vector<8x128xf32> to vector<8x128xbf16>
    %cst_80 = arith.constant dense<0.000000e+00> : vector<8x64xf32>
    %305 = tpu.matmul %304, %6, %cst_80 {dimension_numbers = #tpu.dot_dimension_numbers<[1], [0], [0], [1], [0, 0, 1, 1], [], []>} : vector<8x128xbf16>, vector<128x64xbf16>, vector<8x64xf32> -> vector<8x64xf32>
    %306 = vector.broadcast %7 : vector<1x64xf32> to vector<8x64xf32>
    %307 = arith.addf %305, %306 : vector<8x64xf32>
    %308 = arith.negf %307 : vector<8x64xf32>
    %309 = math.exp %308 : vector<8x64xf32>
    %cst_81 = arith.constant 1.000000e+00 : f32
    %310 = vector.broadcast %cst_81 : f32 to vector<8x64xf32>
    %311 = arith.addf %310, %309 : vector<8x64xf32>
    %312 = arith.divf %310, %311 : vector<8x64xf32>
    %313 = vector.extract_strided_slice %312 {offsets = [0, 0], sizes = [8, 32], strides = [1, 1]} : vector<8x64xf32> to vector<8x32xf32>
    %314 = arith.truncf %313 : vector<8x32xf32> to vector<8x32xbf16>
    %cst_82 = arith.constant dense<0.000000e+00> : vector<8x128xf32>
    %315 = tpu.matmul %314, %8, %cst_82 {dimension_numbers = #tpu.dot_dimension_numbers<[1], [0], [0], [1], [0, 0, 1, 1], [], []>} : vector<8x32xbf16>, vector<32x128xbf16>, vector<8x128xf32> -> vector<8x128xf32>
    %316 = vector.broadcast %c5_i32 : i32 to vector<8x128xi32>
    %317 = arith.cmpi eq, %10, %316 : vector<8x128xi32>
    %318 = arith.select %317, %315, %267 : vector<8x128xi1>, vector<8x128xf32>
    %c6_i32 = arith.constant 6 : i32
    %319 = arith.truncf %312 : vector<8x64xf32> to vector<8x64xbf16>
    %320 = arith.index_cast %c6_i32 : i32 to index
    %c0_83 = arith.constant 0 : index
    %c0_84 = arith.constant 0 : index
    %321 = vector.load %arg0[%320, %c0_83, %c0_84] : memref<8x8x8xbf16, #tpu.memory_space<vmem>>, vector<1x8x8xbf16>
    %322 = vector.shape_cast %321 : vector<1x8x8xbf16> to vector<8x8xbf16>
    %cst_85 = arith.constant dense<0.000000e+00> : vector<8x128xf32>
    %323 = tpu.matmul %322, %1, %cst_85 {dimension_numbers = #tpu.dot_dimension_numbers<[1], [0], [0], [1], [0, 0, 1, 1], [], []>} : vector<8x8xbf16>, vector<8x128xbf16>, vector<8x128xf32> -> vector<8x128xf32>
    %324 = vector.extract_strided_slice %319 {offsets = [0, 0], sizes = [8, 32], strides = [1, 1]} : vector<8x64xbf16> to vector<8x32xbf16>
    %cst_86 = arith.constant dense<0.000000e+00> : vector<8x128xf32>
    %325 = tpu.matmul %324, %2, %cst_86 {dimension_numbers = #tpu.dot_dimension_numbers<[1], [0], [0], [1], [0, 0, 1, 1], [], []>} : vector<8x32xbf16>, vector<32x128xbf16>, vector<8x128xf32> -> vector<8x128xf32>
    %326 = arith.addf %323, %325 : vector<8x128xf32>
    %327 = vector.broadcast %3 : vector<1x128xf32> to vector<8x128xf32>
    %328 = arith.addf %326, %327 : vector<8x128xf32>
    %c96_i32_87 = arith.constant 96 : i32
    %329 = vector.broadcast %c96_i32_87 : i32 to vector<8x128xi32>
    %330 = arith.cmpi slt, %9, %329 : vector<8x128xi32>
    %331 = arith.negf %328 : vector<8x128xf32>
    %332 = math.exp %331 : vector<8x128xf32>
    %cst_88 = arith.constant 1.000000e+00 : f32
    %333 = vector.broadcast %cst_88 : f32 to vector<8x128xf32>
    %334 = arith.addf %333, %332 : vector<8x128xf32>
    %335 = arith.divf %333, %334 : vector<8x128xf32>
    %336 = math.tanh %328 : vector<8x128xf32>
    %337 = arith.select %330, %335, %336 : vector<8x128xi1>, vector<8x128xf32>
    %338 = vector.extract_strided_slice %337 {offsets = [0, 0], sizes = [8, 32], strides = [1, 1]} : vector<8x128xf32> to vector<8x32xf32>
    %339 = vector.extract_strided_slice %337 {offsets = [0, 32], sizes = [8, 32], strides = [1, 1]} : vector<8x128xf32> to vector<8x32xf32>
    %340 = vector.extract_strided_slice %337 {offsets = [0, 64], sizes = [8, 32], strides = [1, 1]} : vector<8x128xf32> to vector<8x32xf32>
    %341 = vector.extract_strided_slice %337 {offsets = [0, 96], sizes = [8, 32], strides = [1, 1]} : vector<8x128xf32> to vector<8x32xf32>
    %342 = vector.extract_strided_slice %312 {offsets = [0, 32], sizes = [8, 32], strides = [1, 1]} : vector<8x64xf32> to vector<8x32xf32>
    %343 = arith.mulf %339, %342 : vector<8x32xf32>
    %344 = arith.mulf %338, %341 : vector<8x32xf32>
    %345 = arith.addf %343, %344 : vector<8x32xf32>
    %346 = math.tanh %342 : vector<8x32xf32>
    %347 = arith.mulf %340, %346 : vector<8x32xf32>
    %cst_89 = arith.constant dense<0.000000e+00> : vector<8x64xf32>
    %348 = tpu.matmul %319, %4, %cst_89 {dimension_numbers = #tpu.dot_dimension_numbers<[1], [0], [0], [1], [0, 0, 1, 1], [], []>} : vector<8x64xbf16>, vector<64x64xbf16>, vector<8x64xf32> -> vector<8x64xf32>
    %349 = vector.broadcast %5 : vector<1x64xf32> to vector<8x64xf32>
    %350 = arith.addf %348, %349 : vector<8x64xf32>
    %351 = arith.truncf %350 : vector<8x64xf32> to vector<8x64xbf16>
    %cst_90 = arith.constant dense<0.000000e+00> : vector<8x64xf32>
    %352 = tpu.matmul %0, %351, %cst_90 {dimension_numbers = #tpu.dot_dimension_numbers<[1], [0], [0], [1], [0, 0, 1, 1], [], []>} : vector<8x8xbf16>, vector<8x64xbf16>, vector<8x64xf32> -> vector<8x64xf32>
    %353 = math.tanh %352 : vector<8x64xf32>
    %354 = tpu.concatenate %347, %345, %353 in 1 : vector<8x32xf32>, vector<8x32xf32>, vector<8x64xf32> -> vector<8x128xf32>
    %355 = arith.truncf %354 : vector<8x128xf32> to vector<8x128xbf16>
    %cst_91 = arith.constant dense<0.000000e+00> : vector<8x64xf32>
    %356 = tpu.matmul %355, %6, %cst_91 {dimension_numbers = #tpu.dot_dimension_numbers<[1], [0], [0], [1], [0, 0, 1, 1], [], []>} : vector<8x128xbf16>, vector<128x64xbf16>, vector<8x64xf32> -> vector<8x64xf32>
    %357 = vector.broadcast %7 : vector<1x64xf32> to vector<8x64xf32>
    %358 = arith.addf %356, %357 : vector<8x64xf32>
    %359 = arith.negf %358 : vector<8x64xf32>
    %360 = math.exp %359 : vector<8x64xf32>
    %cst_92 = arith.constant 1.000000e+00 : f32
    %361 = vector.broadcast %cst_92 : f32 to vector<8x64xf32>
    %362 = arith.addf %361, %360 : vector<8x64xf32>
    %363 = arith.divf %361, %362 : vector<8x64xf32>
    %364 = vector.extract_strided_slice %363 {offsets = [0, 0], sizes = [8, 32], strides = [1, 1]} : vector<8x64xf32> to vector<8x32xf32>
    %365 = arith.truncf %364 : vector<8x32xf32> to vector<8x32xbf16>
    %cst_93 = arith.constant dense<0.000000e+00> : vector<8x128xf32>
    %366 = tpu.matmul %365, %8, %cst_93 {dimension_numbers = #tpu.dot_dimension_numbers<[1], [0], [0], [1], [0, 0, 1, 1], [], []>} : vector<8x32xbf16>, vector<32x128xbf16>, vector<8x128xf32> -> vector<8x128xf32>
    %367 = vector.broadcast %c6_i32 : i32 to vector<8x128xi32>
    %368 = arith.cmpi eq, %10, %367 : vector<8x128xi32>
    %369 = arith.select %368, %366, %318 : vector<8x128xi1>, vector<8x128xf32>
    %c7_i32 = arith.constant 7 : i32
    %370 = arith.truncf %363 : vector<8x64xf32> to vector<8x64xbf16>
    %371 = arith.index_cast %c7_i32 : i32 to index
    %c0_94 = arith.constant 0 : index
    %c0_95 = arith.constant 0 : index
    %372 = vector.load %arg0[%371, %c0_94, %c0_95] : memref<8x8x8xbf16, #tpu.memory_space<vmem>>, vector<1x8x8xbf16>
    %373 = vector.shape_cast %372 : vector<1x8x8xbf16> to vector<8x8xbf16>
    %cst_96 = arith.constant dense<0.000000e+00> : vector<8x128xf32>
    %374 = tpu.matmul %373, %1, %cst_96 {dimension_numbers = #tpu.dot_dimension_numbers<[1], [0], [0], [1], [0, 0, 1, 1], [], []>} : vector<8x8xbf16>, vector<8x128xbf16>, vector<8x128xf32> -> vector<8x128xf32>
    %375 = vector.extract_strided_slice %370 {offsets = [0, 0], sizes = [8, 32], strides = [1, 1]} : vector<8x64xbf16> to vector<8x32xbf16>
    %cst_97 = arith.constant dense<0.000000e+00> : vector<8x128xf32>
    %376 = tpu.matmul %375, %2, %cst_97 {dimension_numbers = #tpu.dot_dimension_numbers<[1], [0], [0], [1], [0, 0, 1, 1], [], []>} : vector<8x32xbf16>, vector<32x128xbf16>, vector<8x128xf32> -> vector<8x128xf32>
    %377 = arith.addf %374, %376 : vector<8x128xf32>
    %378 = vector.broadcast %3 : vector<1x128xf32> to vector<8x128xf32>
    %379 = arith.addf %377, %378 : vector<8x128xf32>
    %c96_i32_98 = arith.constant 96 : i32
    %380 = vector.broadcast %c96_i32_98 : i32 to vector<8x128xi32>
    %381 = arith.cmpi slt, %9, %380 : vector<8x128xi32>
    %382 = arith.negf %379 : vector<8x128xf32>
    %383 = math.exp %382 : vector<8x128xf32>
    %cst_99 = arith.constant 1.000000e+00 : f32
    %384 = vector.broadcast %cst_99 : f32 to vector<8x128xf32>
    %385 = arith.addf %384, %383 : vector<8x128xf32>
    %386 = arith.divf %384, %385 : vector<8x128xf32>
    %387 = math.tanh %379 : vector<8x128xf32>
    %388 = arith.select %381, %386, %387 : vector<8x128xi1>, vector<8x128xf32>
    %389 = vector.extract_strided_slice %388 {offsets = [0, 0], sizes = [8, 32], strides = [1, 1]} : vector<8x128xf32> to vector<8x32xf32>
    %390 = vector.extract_strided_slice %388 {offsets = [0, 32], sizes = [8, 32], strides = [1, 1]} : vector<8x128xf32> to vector<8x32xf32>
    %391 = vector.extract_strided_slice %388 {offsets = [0, 64], sizes = [8, 32], strides = [1, 1]} : vector<8x128xf32> to vector<8x32xf32>
    %392 = vector.extract_strided_slice %388 {offsets = [0, 96], sizes = [8, 32], strides = [1, 1]} : vector<8x128xf32> to vector<8x32xf32>
    %393 = vector.extract_strided_slice %363 {offsets = [0, 32], sizes = [8, 32], strides = [1, 1]} : vector<8x64xf32> to vector<8x32xf32>
    %394 = arith.mulf %390, %393 : vector<8x32xf32>
    %395 = arith.mulf %389, %392 : vector<8x32xf32>
    %396 = arith.addf %394, %395 : vector<8x32xf32>
    %397 = math.tanh %393 : vector<8x32xf32>
    %398 = arith.mulf %391, %397 : vector<8x32xf32>
    %cst_100 = arith.constant dense<0.000000e+00> : vector<8x64xf32>
    %399 = tpu.matmul %370, %4, %cst_100 {dimension_numbers = #tpu.dot_dimension_numbers<[1], [0], [0], [1], [0, 0, 1, 1], [], []>} : vector<8x64xbf16>, vector<64x64xbf16>, vector<8x64xf32> -> vector<8x64xf32>
    %400 = vector.broadcast %5 : vector<1x64xf32> to vector<8x64xf32>
    %401 = arith.addf %399, %400 : vector<8x64xf32>
    %402 = arith.truncf %401 : vector<8x64xf32> to vector<8x64xbf16>
    %cst_101 = arith.constant dense<0.000000e+00> : vector<8x64xf32>
    %403 = tpu.matmul %0, %402, %cst_101 {dimension_numbers = #tpu.dot_dimension_numbers<[1], [0], [0], [1], [0, 0, 1, 1], [], []>} : vector<8x8xbf16>, vector<8x64xbf16>, vector<8x64xf32> -> vector<8x64xf32>
    %404 = math.tanh %403 : vector<8x64xf32>
    %405 = tpu.concatenate %398, %396, %404 in 1 : vector<8x32xf32>, vector<8x32xf32>, vector<8x64xf32> -> vector<8x128xf32>
    %406 = arith.truncf %405 : vector<8x128xf32> to vector<8x128xbf16>
    %cst_102 = arith.constant dense<0.000000e+00> : vector<8x64xf32>
    %407 = tpu.matmul %406, %6, %cst_102 {dimension_numbers = #tpu.dot_dimension_numbers<[1], [0], [0], [1], [0, 0, 1, 1], [], []>} : vector<8x128xbf16>, vector<128x64xbf16>, vector<8x64xf32> -> vector<8x64xf32>
    %408 = vector.broadcast %7 : vector<1x64xf32> to vector<8x64xf32>
    %409 = arith.addf %407, %408 : vector<8x64xf32>
    %410 = arith.negf %409 : vector<8x64xf32>
    %411 = math.exp %410 : vector<8x64xf32>
    %cst_103 = arith.constant 1.000000e+00 : f32
    %412 = vector.broadcast %cst_103 : f32 to vector<8x64xf32>
    %413 = arith.addf %412, %411 : vector<8x64xf32>
    %414 = arith.divf %412, %413 : vector<8x64xf32>
    %415 = vector.extract_strided_slice %414 {offsets = [0, 0], sizes = [8, 32], strides = [1, 1]} : vector<8x64xf32> to vector<8x32xf32>
    %416 = arith.truncf %415 : vector<8x32xf32> to vector<8x32xbf16>
    %cst_104 = arith.constant dense<0.000000e+00> : vector<8x128xf32>
    %417 = tpu.matmul %416, %8, %cst_104 {dimension_numbers = #tpu.dot_dimension_numbers<[1], [0], [0], [1], [0, 0, 1, 1], [], []>} : vector<8x32xbf16>, vector<32x128xbf16>, vector<8x128xf32> -> vector<8x128xf32>
    %418 = vector.broadcast %c7_i32 : i32 to vector<8x128xi32>
    %419 = arith.cmpi eq, %10, %418 : vector<8x128xi32>
    %420 = arith.select %419, %417, %369 : vector<8x128xi1>, vector<8x128xf32>
    %c8_i32 = arith.constant 8 : i32
    %c0_105 = arith.constant 0 : index
    %c0_106 = arith.constant 0 : index
    %421 = vector.load %arg10[%c0_105, %c0_106] : memref<8x128xf32, #tpu.memory_space<vmem>>, vector<8x128xf32>
    tpu.vector_store %arg10[%c0_105, %c0_106], %420 {strides = array<i32>} : memref<8x128xf32, #tpu.memory_space<vmem>>, vector<8x128xf32>,
    return
  }
}

</mosaic_0001>

<bundles_post_ra>
// kernel: rgcn_v0_forward.1
= control target key start
LH: loop header
LB: loop body
LE: loop exit
PB: predicated region body
PF: predicated region fallthrough
CT: control target
= control target key end

     0   :  { %v3552_v0 = vmov 0.0   ;;  %vm3553_vm0 = vmmov 0   ;;  %vm136_vm1 = vcmask 1043456   ;;  %v3554_v5 = vmov 0   ;;  %s3555_s14 = smov 32   ;;  %s3556_s30 = smov 64   ;;  %s4436_s3 = inlined_call_operand.vmem [shape: bf16[32,128], index: 3, kind: input, shape index: {}]   ;;  %s4437_s2 = inlined_call_operand.vmem [shape: bf16[8,128], index: 2, kind: input, shape index: {}]   ;;  %s4438_s5 = inlined_call_operand.vmem [shape: bf16[64,64], index: 5, kind: input, shape index: {}]   ;;  %s4439_s0 = inlined_call_operand.vmem [shape: bf16[8,8,8], index: 0, kind: input, shape index: {}]   ;;  %s4440_s4 = inlined_call_operand.vmem [shape: f32[1,128], index: 4, kind: input, shape index: {}]   ;;  %s4441_s6 = inlined_call_operand.vmem [shape: f32[1,64], index: 6, kind: input, shape index: {}]   ;;  %s4442_s1 = inlined_call_operand.vmem [shape: bf16[8,8], index: 1, kind: input, shape index: {}]   ;;  %s4443_s7 = inlined_call_operand.vmem [shape: bf16[128,64], index: 7, kind: input, shape index: {}]   ;;  %s4444_s9 = inlined_call_operand.vmem [shape: bf16[32,128], index: 9, kind: input, shape index: {}]   ;;  %s4445_s8 = inlined_call_operand.vmem [shape: f32[1,64], index: 8, kind: input, shape index: {}]   ;;  %s4446_s10 = inlined_call_operand.vmem [shape: f32[8,128], index: 10, kind: output, shape index: {}]  }
   0x1   :  { %2881 = vmatprep.subr.bf16.mxu1 %v3552_v0  ;;  %v3616_v1 = vld [vmem:[%s4436_s3] sm:$0xff]   ;;  %2885 = vmatprep.mubr.msk.bf16.mxu1 %vm3553_vm0, %v3552_v0  ;;  %v3627_v2 = vld [vmem:[%s4436_s3 + $0x8] sm:$0xff]   ;;  %vm132_vm2 = vcmask 64512   ;;  %v3664_v9 = vld [vmem:[%s4438_s5 + $0x10] sm:$0xff]   ;;  %v73_v32 = vlaneseq  ;;  %vm88_vm4 = vcmask 261120   ;;  %vm237_vm5 = vcmask 523264  }
   0x2   :  { %2907 = vmatprep.subr.bf16.mxu0 %v3552_v0  ;;  %2909 = vmatprep.mubr.msk.bf16.mxu0 %vm3553_vm0, %v3552_v0  ;;  %v37_v3 = vld [vmem:[%s4437_s2] sm:$0xf]  ;;  %v3655_v8 = vld [vmem:[%s4438_s5 + $0x8] sm:$0xff]   ;;  %v3671_v10 = vld [vmem:[%s4438_s5 + $0x18] sm:$0xff]  }
   0x3   :  { %2882 = vmatpush3.bf16.msra.mxu1 %v3616_v1  ;;  %v3636_v4 = vsel %vm136_vm1, %v37_v3, 0  ;;  %v75_v6 = vld [vmem:[%s4439_s0] sm:$0xf]  ;;  %v3697_v35 = vand.u32 127, %v73_v32  ;;  %v3716_v40 = vld [vmem:[%s4443_s7 + $0x8] sm:$0xff]   ;;  %v3723_v41 = vld [vmem:[%s4443_s7 + $0x10] sm:$0xff]  }
   0x4   :  { %2883 = vmatprep.subr.bf16.mxu1 %v3552_v0  ;;  %v3648_v7 = vld [vmem:[%s4438_s5] sm:$0xff]   ;;  %v3730_v44 = vld [vmem:[%s4443_s7 + $0x18] sm:$0xff]   ;;  %v3745_v46 = vld [vmem:[%s4443_s7 + $0x28] sm:$0xff]  }
   0x5   :  { %v3681_v15 = vld [vmem:[%s4440_s4] ss:$0 sm:$0xff]  ;;  %vm187_vm3 = vcmp.lt.s32.totalorder %v3697_v35, 96  ;;  %v3752_v47 = vld [vmem:[%s4443_s7 + $0x30] sm:$0xff]   ;;  %v3760_v51 = vld [vmem:[%s4443_s7 + $0x38] sm:$0xff]   ;;  %vm495_vm6 = vcmp.eq.s32.totalorder %v3697_v35, 0 }
   0x6   :  { %v3687_v23 = vld [vmem:[%s4441_s6] ss:$0 sm:$0xff]  ;;  %vm796_vm7 = vcmp.eq.s32.totalorder %v3697_v35, 1  ;;  %vm1097_vm8 = vcmp.eq.s32.totalorder %v3697_v35, 2  ;;  %vm1398_vm9 = vcmp.eq.s32.totalorder %v3697_v35, 3  ;;  %vm1699_vm10 = vcmp.eq.s32.totalorder %v3697_v35, 4 }
   0x7   :  { %2884 = vmatpush3.bf16.msra.mxu1 %v3627_v2  ;;  %v3694_v34 = vld [vmem:[%s4442_s1] sm:$0xf]  ;;  %vm2000_vm11 = vcmp.eq.s32.totalorder %v3697_v35, 5  ;;  %vm2301_vm12 = vcmp.eq.s32.totalorder %v3697_v35, 6  ;;  %vm2602_vm13 = vcmp.eq.s32.totalorder %v3697_v35, 7 }
   0x8   :  { %2889 = vmatprep.subr.bf16.mxu1 %v3552_v0  ;;  %v3710_v39 = vld [vmem:[%s4443_s7] sm:$0xff]  }
   0x9   :  { %v3738_v45 = vld [vmem:[%s4443_s7 + $0x20] sm:$0xff]  }
   0xa   :  { %2886 = vmatmul.mubr.bf16.vlgmr.msra.gmra.mrb[0].mxu1 %v3554_v5  ;;  %v3772_v3 = vld [vmem:[%s4444_s9] sm:$0xff]  }
   0xb   :  { %2890 = vmatpush3.bf16.msra.mxu1 %v3636_v4  ;;  %2891 = vmatprep.mubr.msk.bf16.mxu1 %vm3553_vm0, %v3552_v0 }
   0xc   :  { %2895 = vmatprep.subr.bf16.mxu1 %v3552_v0 }
  0x12   :  { %2892 = vmatmul.mubr.msk.bf16.vlgmr.msra.gmra.mrb[4].mxu1 %vm132_vm2, %v75_v6  ;;  %v3786_v6 = vld [vmem:[%s4445_s8] ss:$0 sm:$0xff] }
  0x13   :  { %2896 = vmatpush3.bf16.msra.mxu1 %v3648_v7  ;;  %2903 = vmatprep.mubr.msk.bf16.mxu1 %vm3553_vm0, %v3552_v0 }
  0x14   :  { %2897 = vmatprep.subr.bf16.mxu1 %v3552_v0 }
  0x17   :  { %2898 = vmatpush3.bf16.msra.mxu1 %v3655_v8 }
  0x18   :  { %2899 = vmatprep.subr.bf16.mxu1 %v3552_v0 }
  0x1b   :  { %2900 = vmatpush3.bf16.msra.mxu1 %v3664_v9 }
  0x1c   :  { %2901 = vmatprep.subr.bf16.mxu1 %v3552_v0 }
  0x1f   :  { %2902 = vmatpush3.bf16.msra.mxu1 %v3671_v10 }
  0x20   :  { %2933 = vmatprep.subr.bf16.mxu1 %v3552_v0 }
  0x22   :  { %2904 = vmatmul.mubr.bf16.vlgmr.msra.gmra.mrb[8].mxu1 %v3554_v5  ;;  %v3778_v5 = vld [vmem:[%s4444_s9 + $0x8] sm:$0xff]  }
  0x23   :  { %2937 = vmatprep.mubr.msk.bf16.mxu1 %vm3553_vm0, %v3552_v0  ;;  %2934 = vmatpush3.bf16.msra.mxu1 %v3772_v3 }
  0x24   :  { %2935 = vmatprep.subr.bf16.mxu1 %v3552_v0 }
  0x27   :  { %2936 = vmatpush3.bf16.msra.mxu1 %v3778_v5 }
  0x28   :  { %2941 = vmatprep.subr.bf16.mxu1 %v3552_v0 }
  0xdd   :  { %v126_v11 = vpop.f32.mrb[0].mxu1 }
  0xde   :  { %v2887_v12 = vpop.f32.mrb[1].mxu1 }
  0xdf   :  { %v129_v13 = vpop.f32.mrb[2].mxu1 }
  0xe0   :  { %v2888_v14 = vpop.f32.mrb[3].mxu1 }
  0xe5   :  { %v174_v16 = vpop.f32.mrb[4].mxu1 }
  0xe6   :  { %v175_v17 = vadd.f32 %v174_v16, %v126_v11  ;;  %v2893_v18 = vpop.f32.mrb[5].mxu1 }
  0xe7   :  { %v177_v19 = vpop.f32.mrb[6].mxu1 }
  0xe8   :  { %v186_v20 = vadd.f32 %v3681_v15, %v175_v17  ;;  %v2894_v21 = vpop.f32.mrb[7].mxu1 }
  0xea   :  { %v2613_v22 = vmul.f32 -1.442695, %v186_v20 }
  0xec   :  { %3422 = vpow2.f32 %v2613_v22 }
  0xed   :  { %3424 = vtanh.f32 %v186_v20 }
  0xf5   :  { %v274_v24 = vpop.f32.mrb[8].mxu1 }
  0xf6   :  { %v3423_v25 = vpop.eup %3422  ;;  %v275_v26 = vadd.f32 %v3687_v23, %v274_v24  ;;  %v2905_v27 = vpop.f32.mrb[9].mxu1  ;;  %v2633_v24 = vld [vmem:[%s4439_s0 + $0x4] sm:$0xf] }
  0xf7   :  { %v191_v28 = vadd.f32 1.0, %v3423_v25  ;;  %v277_v29 = vpop.f32.mrb[10].mxu1  ;;  %v3425_v36 = vpop.eup %3424 }
  0xf8   :  { %v280_v30 = vpack.c.bf16 %v275_v26, %v275_v26  ;;  %v2906_v31 = vpop.f32.mrb[11].mxu1 }
  0xf9   :  { %3426 = vrcp.f32 %v191_v28 }
  0xfa   :  { %v285_v33 = vsel %vm136_vm1, %v280_v30, 0 }
  0xfb   :  { %2908 = vmatpush3.bf16.msra.mxu0 %v285_v33 }
  0xfc   :  { %2913 = vmatprep.subr.bf16.mxu0 %v3552_v0 }
  0xfe   :  { %2910 = vmatmul.mubr.msk.bf16.vlgmr.msra.gmra.mrb[0].mxu0 %vm132_vm2, %v3694_v34 }
  0xff   :  { %2929 = vmatprep.mubr.msk.bf16.mxu0 %vm3553_vm0, %v3552_v0  ;;  %2914 = vmatpush3.bf16.msra.mxu0 %v3710_v39 }
 0x100   :  { %2915 = vmatprep.subr.bf16.mxu0 %v3552_v0 }
 0x103   :  { %v3427_v37 = vpop.eup %3426  ;;  %2916 = vmatpush3.bf16.msra.mxu0 %v3716_v40 }
 0x104   :  { %v195_v38 = vsel %vm187_vm3, %v3427_v37, %v3425_v36  ;;  %2917 = vmatprep.subr.bf16.mxu0 %v3552_v0 }
 0x105   :  { %198 = vrot.lane.b32.xlu0 %v195_v38, %s3555_s14  ;;  %v196_v53 = vmul.f32 0.0, %v195_v38 }
 0x107   :  { %2918 = vmatpush3.bf16.msra.mxu0 %v3723_v41 }
 0x108   :  { %2919 = vmatprep.subr.bf16.mxu0 %v3552_v0 }
 0x10b   :  { %2920 = vmatpush3.bf16.msra.mxu0 %v3730_v44 }
 0x10c   :  { %2921 = vmatprep.subr.bf16.mxu0 %v3552_v0 }
 0x10f   :  { %2922 = vmatpush3.bf16.msra.mxu0 %v3738_v45 }
 0x110   :  { %2923 = vmatprep.subr.bf16.mxu0 %v3552_v0 }
 0x113   :  { %2924 = vmatpush3.bf16.msra.mxu0 %v3745_v46 }
 0x114   :  { %2925 = vmatprep.subr.bf16.mxu0 %v3552_v0 }
 0x117   :  { %2926 = vmatpush3.bf16.msra.mxu0 %v3752_v47 }
 0x118   :  { %2927 = vmatprep.subr.bf16.mxu0 %v3552_v0 }
 0x11b   :  { %2928 = vmatpush3.bf16.msra.mxu0 %v3760_v51 }
 0x11c   :  { %2967 = vmatprep.subr.bf16.mxu0 %v3552_v0 }
 0x177   :  { %v199_v42 = vpop.permute.xlu0 %198 }
 0x178   :  { %v201_v43 = vmul.f32 %v199_v42, %v195_v38 }
 0x17a   :  { %203 = vrot.lane.b32.xlu0 %v201_v43, %s3555_s14 }
 0x1d1   :  { %v321_v48 = vpop.f32.mrb[0].mxu0 }
 0x1d2   :  { %3428 = vtanh.f32 %v321_v48  ;;  %v2911_v49 = vpop.f32.mrb[1].mxu0 }
 0x1d3   :  { %v324_v50 = vpop.f32.mrb[2].mxu0 }
 0x1d4   :  { %v2912_v52 = vpop.f32.mrb[3].mxu0 }
 0x1dc   :  { %v3429_v54 = vpop.eup %3428 }
 0x1dd   :  { %v3366_v55 = vpack.i.bf16 %v3429_v54, %v196_v53 }
 0x1df   :  { %3367 = vrot.lane.b32.xlu1 %v3366_v55, %s3556_s30 }
 0x1ec   :  { %v204_v56 = vpop.permute.xlu0 %203 }
 0x1ed   :  { %v206_v58 = vadd.f32 %v204_v56, %v196_v53 }
 0x251   :  { %v3368_v57 = vpop.permute.xlu1 %3367 }
 0x252   :  { %v3370_v59 = vunpack.i.h.bf16 %v3368_v57  ;;  %v3369_v60 = vunpack.i.l.bf16 %v3368_v57 }
 0x254   :  { %v336_v61 = vsel %vm88_vm4, %v3369_v60, %v206_v58 }
 0x255   :  { %v337_v62 = vsel %vm237_vm5, %v336_v61, %v3370_v59 }
 0x256   :  { %v338_v63 = vpack.c.bf16 %v337_v62, %v337_v62 }
 0x258   :  { %2930 = vmatmul.mubr.bf16.vlgmr.msra.gmra.mrb[4].mxu0 %v338_v63 }
 0x259   :  { %2969 = vmatprep.mubr.msk.bf16.mxu0 %vm3553_vm0, %v3552_v0 }
 0x32b   :  { %v427_v11 = vpop.f32.mrb[4].mxu0 }
 0x32c   :  { %v428_v12 = vadd.f32 %v3786_v6, %v427_v11  ;;  %v2931_v13 = vpop.f32.mrb[5].mxu0 }
 0x32d   :  { %v430_v14 = vpop.f32.mrb[6].mxu0 }
 0x32e   :  { %v2629_v16 = vmul.f32 -1.442695, %v428_v12  ;;  %v2932_v17 = vpop.f32.mrb[7].mxu0 }
 0x330   :  { %3430 = vpow2.f32 %v2629_v16 }
 0x33a   :  { %v3431_v18 = vpop.eup %3430 }
 0x33b   :  { %v436_v19 = vadd.f32 1.0, %v3431_v18 }
 0x33d   :  { %3432 = vrcp.f32 %v436_v19 }
 0x347   :  { %v3789_v20 = vpop.eup %3432 }
 0x348   :  { %v439_v21 = vpack.c.bf16 %v3789_v20, %v3789_v20  ;;  %3434 = vtanh.f32 %v3789_v20 }
 0x34a   :  { %2938 = vmatmul.mubr.msk.bf16.vlgmr.msra.gmra.mrb[12].mxu1 %vm88_vm4, %v439_v21 }
 0x34b   :  { %2942 = vmatpush3.bf16.msra.mxu1 %v3616_v1  ;;  %2945 = vmatprep.mubr.msk.bf16.mxu1 %vm3553_vm0, %v3552_v0 }
 0x34c   :  { %2943 = vmatprep.subr.bf16.mxu1 %v3552_v0 }
 0x34f   :  { %2944 = vmatpush3.bf16.msra.mxu1 %v3627_v2 }
 0x350   :  { %2949 = vmatprep.subr.bf16.mxu1 %v3552_v0 }
 0x352   :  { %v3435_v22 = vpop.eup %3434  ;;  %2946 = vmatmul.mubr.msk.bf16.vlgmr.msra.gmra.mrb[16].mxu1 %vm88_vm4, %v439_v21 }
 0x353   :  { %604 = vrot.lane.b32.xlu0 %v3435_v22, %s3555_s14  ;;  %2950 = vmatpush3.bf16.msra.mxu1 %v3636_v4 }
 0x354   :  { %2951 = vmatprep.mubr.msk.bf16.mxu1 %vm3553_vm0, %v3552_v0  ;;  %2955 = vmatprep.subr.bf16.mxu1 %v3552_v0 }
 0x35a   :  { %2952 = vmatmul.mubr.msk.bf16.vlgmr.msra.gmra.mrb[20].mxu1 %vm132_vm2, %v2633_v24 }
 0x35b   :  { %2956 = vmatpush3.bf16.msra.mxu1 %v3648_v7  ;;  %2963 = vmatprep.mubr.msk.bf16.mxu1 %vm3553_vm0, %v3552_v0 }
 0x35c   :  { %2957 = vmatprep.subr.bf16.mxu1 %v3552_v0 }
 0x35f   :  { %2958 = vmatpush3.bf16.msra.mxu1 %v3655_v8 }
 0x360   :  { %2959 = vmatprep.subr.bf16.mxu1 %v3552_v0 }
 0x363   :  { %2960 = vmatpush3.bf16.msra.mxu1 %v3664_v9 }
 0x364   :  { %2961 = vmatprep.subr.bf16.mxu1 %v3552_v0 }
 0x367   :  { %2962 = vmatpush3.bf16.msra.mxu1 %v3671_v10 }
 0x368   :  { %2993 = vmatprep.subr.bf16.mxu1 %v3552_v0 }
 0x36a   :  { %2964 = vmatmul.mubr.msk.bf16.vlgmr.msra.gmra.mrb[24].mxu1 %vm237_vm5, %v439_v21 }
 0x36b   :  { %2994 = vmatpush3.bf16.msra.mxu1 %v3772_v3  ;;  %2997 = vmatprep.mubr.msk.bf16.mxu1 %vm3553_vm0, %v3552_v0 }
 0x36c   :  { %2995 = vmatprep.subr.bf16.mxu1 %v3552_v0 }
 0x36f   :  { %2996 = vmatpush3.bf16.msra.mxu1 %v3778_v5 }
 0x370   :  { %3001 = vmatprep.subr.bf16.mxu1 %v3552_v0 }
 0x3c5   :  { %v605_v16 = vpop.permute.xlu0 %604 }
 0x41d   :  { %v3828_v25 = vpop.f32.mrb[12].mxu1 }
 0x41e   :  { %v2939_v26 = vpop.f32.mrb[13].mxu1 }
 0x41f   :  { %v492_v27 = vpop.f32.mrb[14].mxu1 }
 0x420   :  { %v2940_v28 = vpop.f32.mrb[15].mxu1 }
 0x425   :  { %v533_v29 = vpop.f32.mrb[16].mxu1 }
 0x426   :  { %v2947_v30 = vpop.f32.mrb[17].mxu1 }
 0x427   :  { %v536_v31 = vpop.f32.mrb[18].mxu1 }
 0x428   :  { %v2948_v32 = vpop.f32.mrb[19].mxu1 }
 0x42d   :  { %v576_v33 = vpop.f32.mrb[20].mxu1 }
 0x42e   :  { %v577_v36 = vadd.f32 %v576_v33, %v533_v29  ;;  %v2953_v37 = vpop.f32.mrb[21].mxu1 }
 0x42f   :  { %v579_v38 = vpop.f32.mrb[22].mxu1 }
 0x430   :  { %v582_v42 = vadd.f32 %v3681_v15, %v577_v36  ;;  %v2954_v43 = vpop.f32.mrb[23].mxu1 }
 0x432   :  { %v2636_v48 = vmul.f32 -1.442695, %v582_v42 }
 0x434   :  { %3436 = vpow2.f32 %v2636_v48 }
 0x435   :  { %3438 = vtanh.f32 %v582_v42 }
 0x43d   :  { %v644_v49 = vpop.f32.mrb[24].mxu1 }
 0x43e   :  { %v3437_v50 = vpop.eup %3436  ;;  %v645_v52 = vadd.f32 %v3687_v23, %v644_v49  ;;  %v2965_v53 = vpop.f32.mrb[25].mxu1 }
 0x43f   :  { %v586_v54 = vadd.f32 1.0, %v3437_v50  ;;  %v647_v55 = vpop.f32.mrb[26].mxu1  ;;  %v3439_v59 = vpop.eup %3438  ;;  %v496_v53 = vsel %vm495_vm6, %v3828_v25, 0.0 }
 0x440   :  { %v650_v56 = vpack.c.bf16 %v645_v52, %v645_v52  ;;  %v2966_v57 = vpop.f32.mrb[27].mxu1  ;;  %v2641_v52 = vld [vmem:[%s4439_s0 + $0x8] sm:$0xf] }
 0x441   :  { %3440 = vrcp.f32 %v586_v54 }
 0x442   :  { %v652_v58 = vsel %vm136_vm1, %v650_v56, 0 }
 0x443   :  { %2968 = vmatpush3.bf16.msra.mxu0 %v652_v58 }
 0x444   :  { %2973 = vmatprep.subr.bf16.mxu0 %v3552_v0 }
 0x446   :  { %2970 = vmatmul.mubr.msk.bf16.vlgmr.msra.gmra.mrb[8].mxu0 %vm132_vm2, %v3694_v34 }
 0x447   :  { %2974 = vmatpush3.bf16.msra.mxu0 %v3710_v39  ;;  %2989 = vmatprep.mubr.msk.bf16.mxu0 %vm3553_vm0, %v3552_v0 }
 0x448   :  { %2975 = vmatprep.subr.bf16.mxu0 %v3552_v0 }
 0x44b   :  { %v3441_v60 = vpop.eup %3440  ;;  %2976 = vmatpush3.bf16.msra.mxu0 %v3716_v40 }
 0x44c   :  { %v590_v61 = vsel %vm187_vm3, %v3441_v60, %v3439_v59  ;;  %2977 = vmatprep.subr.bf16.mxu0 %v3552_v0 }
 0x44d   :  { %593 = vrot.lane.b32.xlu1 %v590_v61, %s3555_s14  ;;  %v607_v17 = vmul.f32 %v605_v16, %v590_v61  ;;  %v591_v22 = vmul.f32 %v3789_v20, %v590_v61 }
 0x44f   :  { %2978 = vmatpush3.bf16.msra.mxu0 %v3723_v41 }
 0x450   :  { %2979 = vmatprep.subr.bf16.mxu0 %v3552_v0 }
 0x453   :  { %2980 = vmatpush3.bf16.msra.mxu0 %v3730_v44 }
 0x454   :  { %2981 = vmatprep.subr.bf16.mxu0 %v3552_v0 }
 0x457   :  { %2982 = vmatpush3.bf16.msra.mxu0 %v3738_v45 }
 0x458   :  { %2983 = vmatprep.subr.bf16.mxu0 %v3552_v0 }
 0x45b   :  { %2984 = vmatpush3.bf16.msra.mxu0 %v3745_v46 }
 0x45c   :  { %2985 = vmatprep.subr.bf16.mxu0 %v3552_v0 }
 0x45f   :  { %2986 = vmatpush3.bf16.msra.mxu0 %v3752_v47 }
 0x460   :  { %2987 = vmatprep.subr.bf16.mxu0 %v3552_v0 }
 0x463   :  { %2988 = vmatpush3.bf16.msra.mxu0 %v3760_v51 }
 0x464   :  { %3027 = vmatprep.subr.bf16.mxu0 %v3552_v0 }
 0x4bf   :  { %v594_v62 = vpop.permute.xlu1 %593 }
 0x4c0   :  { %v596_v63 = vmul.f32 %v594_v62, %v590_v61 }
 0x4c2   :  { %598 = vrot.lane.b32.xlu1 %v596_v63, %s3555_s14 }
 0x519   :  { %v688_v11 = vpop.f32.mrb[8].mxu0 }
 0x51a   :  { %3442 = vtanh.f32 %v688_v11  ;;  %v2971_v12 = vpop.f32.mrb[9].mxu0 }
 0x51b   :  { %v691_v13 = vpop.f32.mrb[10].mxu0 }
 0x51c   :  { %v2972_v14 = vpop.f32.mrb[11].mxu0 }
 0x524   :  { %v3443_v18 = vpop.eup %3442 }
 0x525   :  { %v3371_v19 = vpack.i.bf16 %v3443_v18, %v607_v17 }
 0x527   :  { %3372 = vrot.lane.b32.xlu0 %v3371_v19, %s3556_s30 }
 0x534   :  { %v599_v21 = vpop.permute.xlu1 %598 }
 0x535   :  { %v601_v26 = vadd.f32 %v599_v21, %v591_v22 }
 0x599   :  { %v3373_v24 = vpop.permute.xlu0 %3372 }
 0x59a   :  { %v3375_v27 = vunpack.i.h.bf16 %v3373_v24  ;;  %v3374_v28 = vunpack.i.l.bf16 %v3373_v24 }
 0x59c   :  { %v703_v29 = vsel %vm88_vm4, %v3374_v28, %v601_v26 }
 0x59d   :  { %v704_v30 = vsel %vm237_vm5, %v703_v29, %v3375_v27 }
 0x59e   :  { %v705_v31 = vpack.c.bf16 %v704_v30, %v704_v30 }
 0x5a0   :  { %2990 = vmatmul.mubr.bf16.vlgmr.msra.gmra.mrb[12].mxu0 %v705_v31 }
 0x5a1   :  { %3029 = vmatprep.mubr.msk.bf16.mxu0 %vm3553_vm0, %v3552_v0 }
 0x673   :  { %v740_v32 = vpop.f32.mrb[12].mxu0 }
 0x674   :  { %v741_v33 = vadd.f32 %v3786_v6, %v740_v32  ;;  %v2991_v36 = vpop.f32.mrb[13].mxu0 }
 0x675   :  { %v743_v37 = vpop.f32.mrb[14].mxu0 }
 0x676   :  { %v2639_v38 = vmul.f32 -1.442695, %v741_v33  ;;  %v2992_v20 = vpop.f32.mrb[15].mxu0 }
 0x678   :  { %3444 = vpow2.f32 %v2639_v38 }
 0x682   :  { %v3445_v42 = vpop.eup %3444 }
 0x683   :  { %v749_v43 = vadd.f32 1.0, %v3445_v42 }
 0x685   :  { %3446 = vrcp.f32 %v749_v43 }
 0x68f   :  { %v3865_v48 = vpop.eup %3446 }
 0x690   :  { %v752_v49 = vpack.c.bf16 %v3865_v48, %v3865_v48  ;;  %3448 = vtanh.f32 %v3865_v48 }
 0x692   :  { %2998 = vmatmul.mubr.msk.bf16.vlgmr.msra.gmra.mrb[28].mxu1 %vm88_vm4, %v752_v49 }
 0x693   :  { %3002 = vmatpush3.bf16.msra.mxu1 %v3616_v1  ;;  %3005 = vmatprep.mubr.msk.bf16.mxu1 %vm3553_vm0, %v3552_v0 }
 0x694   :  { %3003 = vmatprep.subr.bf16.mxu1 %v3552_v0 }
 0x697   :  { %3004 = vmatpush3.bf16.msra.mxu1 %v3627_v2 }
 0x698   :  { %3009 = vmatprep.subr.bf16.mxu1 %v3552_v0 }
 0x69a   :  { %v3449_v50 = vpop.eup %3448  ;;  %3006 = vmatmul.mubr.msk.bf16.vlgmr.msra.gmra.mrb[32].mxu1 %vm88_vm4, %v752_v49 }
 0x69b   :  { %905 = vrot.lane.b32.xlu0 %v3449_v50, %s3555_s14  ;;  %3010 = vmatpush3.bf16.msra.mxu1 %v3636_v4 }
 0x69c   :  { %3011 = vmatprep.mubr.msk.bf16.mxu1 %vm3553_vm0, %v3552_v0  ;;  %3015 = vmatprep.subr.bf16.mxu1 %v3552_v0 }
 0x6a2   :  { %3012 = vmatmul.mubr.msk.bf16.vlgmr.msra.gmra.mrb[36].mxu1 %vm132_vm2, %v2641_v52 }
 0x6a3   :  { %3016 = vmatpush3.bf16.msra.mxu1 %v3648_v7  ;;  %3023 = vmatprep.mubr.msk.bf16.mxu1 %vm3553_vm0, %v3552_v0 }
 0x6a4   :  { %3017 = vmatprep.subr.bf16.mxu1 %v3552_v0 }
 0x6a7   :  { %3018 = vmatpush3.bf16.msra.mxu1 %v3655_v8 }
 0x6a8   :  { %3019 = vmatprep.subr.bf16.mxu1 %v3552_v0 }
 0x6ab   :  { %3020 = vmatpush3.bf16.msra.mxu1 %v3664_v9 }
 0x6ac   :  { %3021 = vmatprep.subr.bf16.mxu1 %v3552_v0 }
 0x6af   :  { %3022 = vmatpush3.bf16.msra.mxu1 %v3671_v10 }
 0x6b0   :  { %3053 = vmatprep.subr.bf16.mxu1 %v3552_v0 }
 0x6b2   :  { %3024 = vmatmul.mubr.msk.bf16.vlgmr.msra.gmra.mrb[40].mxu1 %vm237_vm5, %v752_v49 }
 0x6b3   :  { %3054 = vmatpush3.bf16.msra.mxu1 %v3772_v3  ;;  %3057 = vmatprep.mubr.msk.bf16.mxu1 %vm3553_vm0, %v3552_v0 }
 0x6b4   :  { %3055 = vmatprep.subr.bf16.mxu1 %v3552_v0 }
 0x6b7   :  { %3056 = vmatpush3.bf16.msra.mxu1 %v3778_v5 }
 0x6b8   :  { %3061 = vmatprep.subr.bf16.mxu1 %v3552_v0 }
 0x70d   :  { %v906_v42 = vpop.permute.xlu0 %905 }
 0x765   :  { %v790_v54 = vpop.f32.mrb[28].mxu1 }
 0x766   :  { %v3907_v55 = vsel %vm796_vm7, %v790_v54, %v496_v53  ;;  %v2999_v56 = vpop.f32.mrb[29].mxu1 }
 0x767   :  { %v793_v57 = vpop.f32.mrb[30].mxu1 }
 0x768   :  { %v3000_v58 = vpop.f32.mrb[31].mxu1 }
 0x76d   :  { %v834_v59 = vpop.f32.mrb[32].mxu1 }
 0x76e   :  { %v3007_v60 = vpop.f32.mrb[33].mxu1 }
 0x76f   :  { %v837_v61 = vpop.f32.mrb[34].mxu1 }
 0x770   :  { %v3008_v62 = vpop.f32.mrb[35].mxu1 }
 0x775   :  { %v877_v63 = vpop.f32.mrb[36].mxu1 }
 0x776   :  { %v878_v11 = vadd.f32 %v877_v63, %v834_v59  ;;  %v3013_v12 = vpop.f32.mrb[37].mxu1 }
 0x777   :  { %v880_v13 = vpop.f32.mrb[38].mxu1 }
 0x778   :  { %v883_v14 = vadd.f32 %v3681_v15, %v878_v11  ;;  %v3014_v16 = vpop.f32.mrb[39].mxu1 }
 0x77a   :  { %v2644_v17 = vmul.f32 -1.442695, %v883_v14 }
 0x77c   :  { %3450 = vpow2.f32 %v2644_v17 }
 0x77d   :  { %3452 = vtanh.f32 %v883_v14 }
 0x785   :  { %v945_v25 = vpop.f32.mrb[40].mxu1 }
 0x786   :  { %v3451_v18 = vpop.eup %3450  ;;  %v946_v19 = vadd.f32 %v3687_v23, %v945_v25  ;;  %v3025_v21 = vpop.f32.mrb[41].mxu1 }
 0x787   :  { %v887_v22 = vadd.f32 1.0, %v3451_v18  ;;  %v948_v24 = vpop.f32.mrb[42].mxu1  ;;  %v3453_v29 = vpop.eup %3452 }
 0x788   :  { %v951_v26 = vpack.c.bf16 %v946_v19, %v946_v19  ;;  %v3026_v27 = vpop.f32.mrb[43].mxu1 }
 0x789   :  { %3454 = vrcp.f32 %v887_v22 }
 0x78a   :  { %v953_v28 = vsel %vm136_vm1, %v951_v26, 0 }
 0x78b   :  { %3028 = vmatpush3.bf16.msra.mxu0 %v953_v28 }
 0x78c   :  { %3033 = vmatprep.subr.bf16.mxu0 %v3552_v0 }
 0x78e   :  { %3030 = vmatmul.mubr.msk.bf16.vlgmr.msra.gmra.mrb[16].mxu0 %vm132_vm2, %v3694_v34 }
 0x78f   :  { %3034 = vmatpush3.bf16.msra.mxu0 %v3710_v39  ;;  %3049 = vmatprep.mubr.msk.bf16.mxu0 %vm3553_vm0, %v3552_v0 }
 0x790   :  { %3035 = vmatprep.subr.bf16.mxu0 %v3552_v0 }
 0x793   :  { %v3455_v30 = vpop.eup %3454  ;;  %3036 = vmatpush3.bf16.msra.mxu0 %v3716_v40 }
 0x794   :  { %v891_v31 = vsel %vm187_vm3, %v3455_v30, %v3453_v29  ;;  %3037 = vmatprep.subr.bf16.mxu0 %v3552_v0 }
 0x795   :  { %894 = vrot.lane.b32.xlu1 %v891_v31, %s3555_s14  ;;  %v908_v43 = vmul.f32 %v906_v42, %v891_v31  ;;  %v892_v53 = vmul.f32 %v3865_v48, %v891_v31 }
 0x797   :  { %3038 = vmatpush3.bf16.msra.mxu0 %v3723_v41 }
 0x798   :  { %3039 = vmatprep.subr.bf16.mxu0 %v3552_v0 }
 0x79b   :  { %3040 = vmatpush3.bf16.msra.mxu0 %v3730_v44 }
 0x79c   :  { %3041 = vmatprep.subr.bf16.mxu0 %v3552_v0 }
 0x79f   :  { %3042 = vmatpush3.bf16.msra.mxu0 %v3738_v45 }
 0x7a0   :  { %3043 = vmatprep.subr.bf16.mxu0 %v3552_v0 }
 0x7a3   :  { %3044 = vmatpush3.bf16.msra.mxu0 %v3745_v46 }
 0x7a4   :  { %3045 = vmatprep.subr.bf16.mxu0 %v3552_v0 }
 0x7a7   :  { %3046 = vmatpush3.bf16.msra.mxu0 %v3752_v47 }
 0x7a8   :  { %3047 = vmatprep.subr.bf16.mxu0 %v3552_v0 }
 0x7ab   :  { %3048 = vmatpush3.bf16.msra.mxu0 %v3760_v51 }
 0x7ac   :  { %3087 = vmatprep.subr.bf16.mxu0 %v3552_v0 }
 0x807   :  { %v895_v32 = vpop.permute.xlu1 %894 }
 0x808   :  { %v897_v33 = vmul.f32 %v895_v32, %v891_v31 }
 0x80a   :  { %899 = vrot.lane.b32.xlu1 %v897_v33, %s3555_s14 }
 0x861   :  { %v989_v36 = vpop.f32.mrb[16].mxu0 }
 0x862   :  { %3456 = vtanh.f32 %v989_v36  ;;  %v3031_v37 = vpop.f32.mrb[17].mxu0 }
 0x863   :  { %v992_v38 = vpop.f32.mrb[18].mxu0 }
 0x864   :  { %v3032_v20 = vpop.f32.mrb[19].mxu0 }
 0x86c   :  { %v3457_v49 = vpop.eup %3456 }
 0x86d   :  { %v3376_v50 = vpack.i.bf16 %v3457_v49, %v908_v43 }
 0x86f   :  { %3377 = vrot.lane.b32.xlu0 %v3376_v50, %s3556_s30 }
 0x87c   :  { %v900_v52 = vpop.permute.xlu1 %899 }
 0x87d   :  { %v902_v56 = vadd.f32 %v900_v52, %v892_v53 }
 0x8e1   :  { %v3378_v54 = vpop.permute.xlu0 %3377 }
 0x8e2   :  { %v3380_v57 = vunpack.i.h.bf16 %v3378_v54  ;;  %v3379_v58 = vunpack.i.l.bf16 %v3378_v54 }
 0x8e4   :  { %v1004_v59 = vsel %vm88_vm4, %v3379_v58, %v902_v56 }
 0x8e5   :  { %v1005_v60 = vsel %vm237_vm5, %v1004_v59, %v3380_v57 }
 0x8e6   :  { %v1006_v61 = vpack.c.bf16 %v1005_v60, %v1005_v60 }
 0x8e8   :  { %3050 = vmatmul.mubr.bf16.vlgmr.msra.gmra.mrb[20].mxu0 %v1006_v61 }
 0x8e9   :  { %3089 = vmatprep.mubr.msk.bf16.mxu0 %vm3553_vm0, %v3552_v0 }
 0x9bb   :  { %v1041_v62 = vpop.f32.mrb[20].mxu0 }
 0x9bc   :  { %v1042_v63 = vadd.f32 %v3786_v6, %v1041_v62  ;;  %v3051_v11 = vpop.f32.mrb[21].mxu0 }
 0x9bd   :  { %v1044_v12 = vpop.f32.mrb[22].mxu0 }
 0x9be   :  { %v2647_v13 = vmul.f32 -1.442695, %v1042_v63  ;;  %v3052_v48 = vpop.f32.mrb[23].mxu0 }
 0x9c0   :  { %3458 = vpow2.f32 %v2647_v13 }
 0x9ca   :  { %v3459_v14 = vpop.eup %3458 }
 0x9cb   :  { %v1050_v16 = vadd.f32 1.0, %v3459_v14 }
 0x9cd   :  { %3460 = vrcp.f32 %v1050_v16 }
 0x9d7   :  { %v3944_v17 = vpop.eup %3460 }
 0x9d8   :  { %v1053_v25 = vpack.c.bf16 %v3944_v17, %v3944_v17  ;;  %3462 = vtanh.f32 %v3944_v17 }
 0x9da   :  { %3058 = vmatmul.mubr.msk.bf16.vlgmr.msra.gmra.mrb[44].mxu1 %vm88_vm4, %v1053_v25 }
 0x9db   :  { %3062 = vmatpush3.bf16.msra.mxu1 %v3616_v1  ;;  %3065 = vmatprep.mubr.msk.bf16.mxu1 %vm3553_vm0, %v3552_v0  ;;  %v2649_v1 = vld [vmem:[%s4439_s0 + $0xc] sm:$0xf] }
 0x9dc   :  { %3063 = vmatprep.subr.bf16.mxu1 %v3552_v0 }
 0x9df   :  { %3064 = vmatpush3.bf16.msra.mxu1 %v3627_v2 }
 0x9e0   :  { %3069 = vmatprep.subr.bf16.mxu1 %v3552_v0 }
 0x9e2   :  { %v3463_v18 = vpop.eup %3462  ;;  %3066 = vmatmul.mubr.msk.bf16.vlgmr.msra.gmra.mrb[48].mxu1 %vm88_vm4, %v1053_v25 }
 0x9e3   :  { %1206 = vrot.lane.b32.xlu0 %v3463_v18, %s3555_s14  ;;  %3070 = vmatpush3.bf16.msra.mxu1 %v3636_v4 }
 0x9e4   :  { %3071 = vmatprep.mubr.msk.bf16.mxu1 %vm3553_vm0, %v3552_v0  ;;  %3075 = vmatprep.subr.bf16.mxu1 %v3552_v0 }
 0x9ea   :  { %3072 = vmatmul.mubr.msk.bf16.vlgmr.msra.gmra.mrb[52].mxu1 %vm132_vm2, %v2649_v1 }
 0x9eb   :  { %3076 = vmatpush3.bf16.msra.mxu1 %v3648_v7  ;;  %3083 = vmatprep.mubr.msk.bf16.mxu1 %vm3553_vm0, %v3552_v0 }
 0x9ec   :  { %3077 = vmatprep.subr.bf16.mxu1 %v3552_v0 }
 0x9ef   :  { %3078 = vmatpush3.bf16.msra.mxu1 %v3655_v8 }
 0x9f0   :  { %3079 = vmatprep.subr.bf16.mxu1 %v3552_v0 }
 0x9f3   :  { %3080 = vmatpush3.bf16.msra.mxu1 %v3664_v9 }
 0x9f4   :  { %3081 = vmatprep.subr.bf16.mxu1 %v3552_v0 }
 0x9f7   :  { %3082 = vmatpush3.bf16.msra.mxu1 %v3671_v10 }
 0x9f8   :  { %3113 = vmatprep.subr.bf16.mxu1 %v3552_v0 }
 0x9fa   :  { %3084 = vmatmul.mubr.msk.bf16.vlgmr.msra.gmra.mrb[56].mxu1 %vm237_vm5, %v1053_v25 }
 0x9fb   :  { %3114 = vmatpush3.bf16.msra.mxu1 %v3772_v3  ;;  %3117 = vmatprep.mubr.msk.bf16.mxu1 %vm3553_vm0, %v3552_v0 }
 0x9fc   :  { %3115 = vmatprep.subr.bf16.mxu1 %v3552_v0 }
 0x9ff   :  { %3116 = vmatpush3.bf16.msra.mxu1 %v3778_v5 }
 0xa00   :  { %3121 = vmatprep.subr.bf16.mxu1 %v3552_v0 }
 0xa55   :  { %v1207_v58 = vpop.permute.xlu0 %1206 }
 0xaad   :  { %v1091_v2 = vpop.f32.mrb[44].mxu1 }
 0xaae   :  { %v3985_v7 = vsel %vm1097_vm8, %v1091_v2, %v3907_v55  ;;  %v3059_v8 = vpop.f32.mrb[45].mxu1 }
 0xaaf   :  { %v1094_v9 = vpop.f32.mrb[46].mxu1 }
 0xab0   :  { %v3060_v10 = vpop.f32.mrb[47].mxu1 }
 0xab5   :  { %v1135_v19 = vpop.f32.mrb[48].mxu1 }
 0xab6   :  { %v3067_v21 = vpop.f32.mrb[49].mxu1 }
 0xab7   :  { %v1138_v22 = vpop.f32.mrb[50].mxu1 }
 0xab8   :  { %v3068_v24 = vpop.f32.mrb[51].mxu1 }
 0xab9   :  { %v4031_v24 = vld [vmem:[%s4436_s3] sm:$0xff]  }
 0xabd   :  { %v1178_v26 = vpop.f32.mrb[52].mxu1 }
 0xabe   :  { %v1179_v27 = vadd.f32 %v1178_v26, %v1135_v19  ;;  %v3073_v28 = vpop.f32.mrb[53].mxu1  ;;  %v4040_v26 = vld [vmem:[%s4436_s3 + $0x8] sm:$0xff]  }
 0xabf   :  { %v1181_v29 = vpop.f32.mrb[54].mxu1  ;;  %v2657_v28 = vld [vmem:[%s4439_s0 + $0x10] sm:$0xf] }
 0xac0   :  { %v1184_v30 = vadd.f32 %v3681_v15, %v1179_v27  ;;  %v3074_v31 = vpop.f32.mrb[55].mxu1  ;;  %v4057_v29 = vld [vmem:[%s4438_s5] sm:$0xff]  }
 0xac1   :  { %v4073_v31 = vld [vmem:[%s4438_s5 + $0x10] sm:$0xff]  }
 0xac2   :  { %v2652_v32 = vmul.f32 -1.442695, %v1184_v30 }
 0xac4   :  { %3464 = vpow2.f32 %v2652_v32  ;;  %v4080_v32 = vld [vmem:[%s4438_s5 + $0x18] sm:$0xff]  }
 0xac5   :  { %3466 = vtanh.f32 %v1184_v30  ;;  %v4066_v30 = vld [vmem:[%s4438_s5 + $0x8] sm:$0xff]  }
 0xacd   :  { %v1246_v33 = vpop.f32.mrb[56].mxu1 }
 0xace   :  { %v3465_v36 = vpop.eup %3464  ;;  %v1247_v55 = vadd.f32 %v3687_v23, %v1246_v33  ;;  %v3085_v37 = vpop.f32.mrb[57].mxu1 }
 0xacf   :  { %v1188_v38 = vadd.f32 1.0, %v3465_v36  ;;  %v1249_v20 = vpop.f32.mrb[58].mxu1  ;;  %v3467_v15 = vpop.eup %3466 }
 0xad0   :  { %v1252_v42 = vpack.c.bf16 %v1247_v55, %v1247_v55  ;;  %v3086_v43 = vpop.f32.mrb[59].mxu1 }
 0xad1   :  { %3468 = vrcp.f32 %v1188_v38 }
 0xad2   :  { %v1254_v49 = vsel %vm136_vm1, %v1252_v42, 0 }
 0xad3   :  { %3088 = vmatpush3.bf16.msra.mxu0 %v1254_v49 }
 0xad4   :  { %3093 = vmatprep.subr.bf16.mxu0 %v3552_v0 }
 0xad6   :  { %3090 = vmatmul.mubr.msk.bf16.vlgmr.msra.gmra.mrb[24].mxu0 %vm132_vm2, %v3694_v34 }
 0xad7   :  { %3094 = vmatpush3.bf16.msra.mxu0 %v3710_v39  ;;  %3109 = vmatprep.mubr.msk.bf16.mxu0 %vm3553_vm0, %v3552_v0 }
 0xad8   :  { %3095 = vmatprep.subr.bf16.mxu0 %v3552_v0 }
 0xadb   :  { %v3469_v23 = vpop.eup %3468  ;;  %3096 = vmatpush3.bf16.msra.mxu0 %v3716_v40 }
 0xadc   :  { %v1192_v50 = vsel %vm187_vm3, %v3469_v23, %v3467_v15  ;;  %3097 = vmatprep.subr.bf16.mxu0 %v3552_v0 }
 0xadd   :  { %1195 = vrot.lane.b32.xlu1 %v1192_v50, %s3555_s14  ;;  %v1209_v59 = vmul.f32 %v1207_v58, %v1192_v50  ;;  %v1193_v63 = vmul.f32 %v3944_v17, %v1192_v50 }
 0xadf   :  { %3098 = vmatpush3.bf16.msra.mxu0 %v3723_v41 }
 0xae0   :  { %3099 = vmatprep.subr.bf16.mxu0 %v3552_v0 }
 0xae3   :  { %3100 = vmatpush3.bf16.msra.mxu0 %v3730_v44 }
 0xae4   :  { %3101 = vmatprep.subr.bf16.mxu0 %v3552_v0 }
 0xae7   :  { %3102 = vmatpush3.bf16.msra.mxu0 %v3738_v45 }
 0xae8   :  { %3103 = vmatprep.subr.bf16.mxu0 %v3552_v0 }
 0xaeb   :  { %3104 = vmatpush3.bf16.msra.mxu0 %v3745_v46 }
 0xaec   :  { %3105 = vmatprep.subr.bf16.mxu0 %v3552_v0 }
 0xaef   :  { %3106 = vmatpush3.bf16.msra.mxu0 %v3752_v47 }
 0xaf0   :  { %3107 = vmatprep.subr.bf16.mxu0 %v3552_v0 }
 0xaf3   :  { %3108 = vmatpush3.bf16.msra.mxu0 %v3760_v51 }
 0xaf4   :  { %3147 = vmatprep.subr.bf16.mxu0 %v3552_v0 }
 0xb4f   :  { %v1196_v34 = vpop.permute.xlu1 %1195 }
 0xb50   :  { %v1198_v52 = vmul.f32 %v1196_v34, %v1192_v50 }
 0xb52   :  { %1200 = vrot.lane.b32.xlu1 %v1198_v52, %s3555_s14 }
 0xba9   :  { %v1290_v53 = vpop.f32.mrb[24].mxu0 }
 0xbaa   :  { %3470 = vtanh.f32 %v1290_v53  ;;  %v3091_v54 = vpop.f32.mrb[25].mxu0 }
 0xbab   :  { %v1293_v56 = vpop.f32.mrb[26].mxu0 }
 0xbac   :  { %v3092_v57 = vpop.f32.mrb[27].mxu0  ;;  %v4104_v56 = vld [vmem:[%s4441_s6] ss:$0 sm:$0xff] }
 0xbb4   :  { %v3471_v60 = vpop.eup %3470 }
 0xbb5   :  { %v3381_v61 = vpack.i.bf16 %v3471_v60, %v1209_v59 }
 0xbb7   :  { %3382 = vrot.lane.b32.xlu0 %v3381_v61, %s3556_s30 }
 0xbc4   :  { %v1201_v62 = vpop.permute.xlu1 %1200 }
 0xbc5   :  { %v1203_v12 = vadd.f32 %v1201_v62, %v1193_v63 }
 0xc29   :  { %v3383_v11 = vpop.permute.xlu0 %3382 }
 0xc2a   :  { %v3385_v13 = vunpack.i.h.bf16 %v3383_v11  ;;  %v3384_v48 = vunpack.i.l.bf16 %v3383_v11  ;;  %v4112_v11 = vld [vmem:[%s4442_s1] sm:$0xf] }
 0xc2c   :  { %v1305_v14 = vsel %vm88_vm4, %v3384_v48, %v1203_v12 }
 0xc2d   :  { %v1306_v16 = vsel %vm237_vm5, %v1305_v14, %v3385_v13 }
 0xc2e   :  { %v1307_v25 = vpack.c.bf16 %v1306_v16, %v1306_v16 }
 0xc30   :  { %3110 = vmatmul.mubr.bf16.vlgmr.msra.gmra.mrb[28].mxu0 %v1307_v25 }
 0xc31   :  { %3149 = vmatprep.mubr.msk.bf16.mxu0 %vm3553_vm0, %v3552_v0 }
 0xd03   :  { %v1342_v18 = vpop.f32.mrb[28].mxu0 }
 0xd04   :  { %v1343_v1 = vadd.f32 %v3786_v6, %v1342_v18  ;;  %v3111_v2 = vpop.f32.mrb[29].mxu0 }
 0xd05   :  { %v1345_v8 = vpop.f32.mrb[30].mxu0 }
 0xd06   :  { %v2655_v9 = vmul.f32 -1.442695, %v1343_v1  ;;  %v3112_v17 = vpop.f32.mrb[31].mxu0 }
 0xd08   :  { %3472 = vpow2.f32 %v2655_v9 }
 0xd12   :  { %v3473_v10 = vpop.eup %3472 }
 0xd13   :  { %v1351_v19 = vadd.f32 1.0, %v3473_v10 }
 0xd15   :  { %3474 = vrcp.f32 %v1351_v19 }
 0xd1f   :  { %v4022_v21 = vpop.eup %3474 }
 0xd20   :  { %v1354_v22 = vpack.c.bf16 %v4022_v21, %v4022_v21  ;;  %3476 = vtanh.f32 %v4022_v21 }
 0xd22   :  { %3118 = vmatmul.mubr.msk.bf16.vlgmr.msra.gmra.mrb[60].mxu1 %vm88_vm4, %v1354_v22 }
 0xd23   :  { %3122 = vmatpush3.bf16.msra.mxu1 %v4031_v24  ;;  %3125 = vmatprep.mubr.msk.bf16.mxu1 %vm3553_vm0, %v3552_v0 }
 0xd24   :  { %3123 = vmatprep.subr.bf16.mxu1 %v3552_v0 }
 0xd27   :  { %3124 = vmatpush3.bf16.msra.mxu1 %v4040_v26 }
 0xd28   :  { %3129 = vmatprep.subr.bf16.mxu1 %v3552_v0 }
 0xd2a   :  { %v3477_v27 = vpop.eup %3476  ;;  %3126 = vmatmul.mubr.msk.bf16.vlgmr.msra.gmra.mrb[64].mxu1 %vm88_vm4, %v1354_v22 }
 0xd2b   :  { %1507 = vrot.lane.b32.xlu0 %v3477_v27, %s3555_s14  ;;  %3130 = vmatpush3.bf16.msra.mxu1 %v3636_v4 }
 0xd2c   :  { %3131 = vmatprep.mubr.msk.bf16.mxu1 %vm3553_vm0, %v3552_v0  ;;  %3135 = vmatprep.subr.bf16.mxu1 %v3552_v0 }
 0xd32   :  { %3132 = vmatmul.mubr.msk.bf16.vlgmr.msra.gmra.mrb[68].mxu1 %vm132_vm2, %v2657_v28 }
 0xd33   :  { %3136 = vmatpush3.bf16.msra.mxu1 %v4057_v29  ;;  %3143 = vmatprep.mubr.msk.bf16.mxu1 %vm3553_vm0, %v3552_v0 }
 0xd34   :  { %3137 = vmatprep.subr.bf16.mxu1 %v3552_v0 }
 0xd37   :  { %3138 = vmatpush3.bf16.msra.mxu1 %v4066_v30 }
 0xd38   :  { %3139 = vmatprep.subr.bf16.mxu1 %v3552_v0 }
 0xd3b   :  { %3140 = vmatpush3.bf16.msra.mxu1 %v4073_v31 }
 0xd3c   :  { %3141 = vmatprep.subr.bf16.mxu1 %v3552_v0 }
 0xd3f   :  { %3142 = vmatpush3.bf16.msra.mxu1 %v4080_v32 }
 0xd40   :  { %3173 = vmatprep.subr.bf16.mxu1 %v3552_v0 }
 0xd42   :  { %3144 = vmatmul.mubr.msk.bf16.vlgmr.msra.gmra.mrb[72].mxu1 %vm237_vm5, %v1354_v22 }
 0xd43   :  { %3174 = vmatpush3.bf16.msra.mxu1 %v3772_v3  ;;  %3177 = vmatprep.mubr.msk.bf16.mxu1 %vm3553_vm0, %v3552_v0 }
 0xd44   :  { %3175 = vmatprep.subr.bf16.mxu1 %v3552_v0 }
 0xd47   :  { %3176 = vmatpush3.bf16.msra.mxu1 %v3778_v5  ;;  %v4098_v5 = vld [vmem:[%s4440_s4] ss:$0 sm:$0xff] }
 0xd48   :  { %3181 = vmatprep.subr.bf16.mxu1 %v3552_v0 }
 0xdf5   :  { %v1392_v33 = vpop.f32.mrb[60].mxu1 }
 0xdf6   :  { %v4093_v36 = vsel %vm1398_vm9, %v1392_v33, %v3985_v7  ;;  %v3119_v55 = vpop.f32.mrb[61].mxu1 }
 0xdf7   :  { %v1395_v37 = vpop.f32.mrb[62].mxu1 }
 0xdf8   :  { %v3120_v38 = vpop.f32.mrb[63].mxu1 }
 0xdfd   :  { %v1436_v20 = vpop.f32.mrb[64].mxu1 }
 0xdfe   :  { %v3127_v3 = vpop.f32.mrb[65].mxu1 }
 0xdff   :  { %v1439_v42 = vpop.f32.mrb[66].mxu1 }
 0xe00   :  { %v3128_v43 = vpop.f32.mrb[67].mxu1  ;;  %v2665_v42 = vld [vmem:[%s4439_s0 + $0x14] sm:$0xf] }
 0xe01   :  { %v4181_v43 = vld [vmem:[%s4444_s9] sm:$0xff]  }
 0xe05   :  { %v1479_v49 = vpop.f32.mrb[68].mxu1 }
 0xe06   :  { %v1480_v15 = vadd.f32 %v1479_v49, %v1436_v20  ;;  %v3133_v23 = vpop.f32.mrb[69].mxu1  ;;  %v4190_v49 = vld [vmem:[%s4444_s9 + $0x8] sm:$0xff]  }
 0xe07   :  { %v1482_v50 = vpop.f32.mrb[70].mxu1 }
 0xe08   :  { %v1485_v34 = vadd.f32 %v4098_v5, %v1480_v15  ;;  %v3134_v7 = vpop.f32.mrb[71].mxu1 }
 0xe0a   :  { %v2660_v52 = vmul.f32 -1.442695, %v1485_v34 }
 0xe0c   :  { %3478 = vpow2.f32 %v2660_v52 }
 0xe0d   :  { %3480 = vtanh.f32 %v1485_v34 }
 0xe15   :  { %v1547_v53 = vpop.f32.mrb[72].mxu1 }
 0xe16   :  { %v3479_v54 = vpop.eup %3478  ;;  %v1548_v57 = vadd.f32 %v4104_v56, %v1547_v53  ;;  %v3145_v58 = vpop.f32.mrb[73].mxu1 }
 0xe17   :  { %v1489_v59 = vadd.f32 1.0, %v3479_v54  ;;  %v1550_v60 = vpop.f32.mrb[74].mxu1  ;;  %v3481_v12 = vpop.eup %3480 }
 0xe18   :  { %v1553_v61 = vpack.c.bf16 %v1548_v57, %v1548_v57  ;;  %v3146_v62 = vpop.f32.mrb[75].mxu1 }
 0xe19   :  { %3482 = vrcp.f32 %v1489_v59 }
 0xe1a   :  { %v1555_v63 = vsel %vm136_vm1, %v1553_v61, 0 }
 0xe1b   :  { %3148 = vmatpush3.bf16.msra.mxu0 %v1555_v63 }
 0xe1c   :  { %3153 = vmatprep.subr.bf16.mxu0 %v3552_v0 }
 0xe1e   :  { %3150 = vmatmul.mubr.msk.bf16.vlgmr.msra.gmra.mrb[32].mxu0 %vm132_vm2, %v4112_v11 }
 0xe1f   :  { %3154 = vmatpush3.bf16.msra.mxu0 %v3710_v39  ;;  %3169 = vmatprep.mubr.msk.bf16.mxu0 %vm3553_vm0, %v3552_v0 }
 0xe20   :  { %3155 = vmatprep.subr.bf16.mxu0 %v3552_v0 }
 0xe23   :  { %v3483_v13 = vpop.eup %3482  ;;  %3156 = vmatpush3.bf16.msra.mxu0 %v3716_v40 }
 0xe24   :  { %v1493_v48 = vsel %vm187_vm3, %v3483_v13, %v3481_v12  ;;  %3157 = vmatprep.subr.bf16.mxu0 %v3552_v0 }
 0xe25   :  { %1496 = vrot.lane.b32.xlu1 %v1493_v48, %s3555_s14 }
 0xe27   :  { %3158 = vmatpush3.bf16.msra.mxu0 %v3723_v41 }
 0xe28   :  { %3159 = vmatprep.subr.bf16.mxu0 %v3552_v0 }
 0xe2b   :  { %3160 = vmatpush3.bf16.msra.mxu0 %v3730_v44 }
 0xe2c   :  { %3161 = vmatprep.subr.bf16.mxu0 %v3552_v0 }
 0xe2f   :  { %3162 = vmatpush3.bf16.msra.mxu0 %v3738_v45 }
 0xe30   :  { %3163 = vmatprep.subr.bf16.mxu0 %v3552_v0 }
 0xe33   :  { %3164 = vmatpush3.bf16.msra.mxu0 %v3745_v46  ;;  %v1508_v46 = vpop.permute.xlu0 %1507 }
 0xe34   :  { %3165 = vmatprep.subr.bf16.mxu0 %v3552_v0  ;;  %v1510_v16 = vmul.f32 %v1508_v46, %v1493_v48  ;;  %v4207_v46 = vld [vmem:[%s4443_s7] sm:$0xff]  }
 0xe37   :  { %3166 = vmatpush3.bf16.msra.mxu0 %v3752_v47 }
 0xe38   :  { %3167 = vmatprep.subr.bf16.mxu0 %v3552_v0 }
 0xe3b   :  { %3168 = vmatpush3.bf16.msra.mxu0 %v3760_v51  ;;  %v1494_v51 = vmul.f32 %v4022_v21, %v1493_v48 }
 0xe3c   :  { %3207 = vmatprep.subr.bf16.mxu0 %v3552_v0 }
 0xe97   :  { %v1497_v39 = vpop.permute.xlu1 %1496 }
 0xe98   :  { %v1499_v40 = vmul.f32 %v1497_v39, %v1493_v48 }
 0xe9a   :  { %1501 = vrot.lane.b32.xlu1 %v1499_v40, %s3555_s14 }
 0xef1   :  { %v1591_v41 = vpop.f32.mrb[32].mxu0 }
 0xef2   :  { %3484 = vtanh.f32 %v1591_v41  ;;  %v3151_v44 = vpop.f32.mrb[33].mxu0 }
 0xef3   :  { %v1594_v45 = vpop.f32.mrb[34].mxu0 }
 0xef4   :  { %v3152_v14 = vpop.f32.mrb[35].mxu0 }
 0xefc   :  { %v3485_v25 = vpop.eup %3484 }
 0xefd   :  { %v3386_v18 = vpack.i.bf16 %v3485_v25, %v1510_v16 }
 0xeff   :  { %3387 = vrot.lane.b32.xlu0 %v3386_v18, %s3556_s30  ;;  %v4216_v18 = vld [vmem:[%s4443_s7 + $0x8] sm:$0xff]  }
 0xf0c   :  { %v1502_v47 = vpop.permute.xlu1 %1501 }
 0xf0d   :  { %v1504_v2 = vadd.f32 %v1502_v47, %v1494_v51  ;;  %v4226_v51 = vld [vmem:[%s4443_s7 + $0x10] sm:$0xff]  }
 0xf71   :  { %v3388_v1 = vpop.permute.xlu0 %3387 }
 0xf72   :  { %v3390_v8 = vunpack.i.h.bf16 %v3388_v1  ;;  %v3389_v9 = vunpack.i.l.bf16 %v3388_v1  ;;  %v4233_v1 = vld [vmem:[%s4443_s7 + $0x18] sm:$0xff]  }
 0xf74   :  { %v1606_v17 = vsel %vm88_vm4, %v3389_v9, %v1504_v2  ;;  %v4240_v2 = vld [vmem:[%s4443_s7 + $0x20] sm:$0xff]   ;;  %v4254_v9 = vld [vmem:[%s4443_s7 + $0x30] sm:$0xff]  }
 0xf75   :  { %v1607_v10 = vsel %vm237_vm5, %v1606_v17, %v3390_v8  ;;  %v4247_v8 = vld [vmem:[%s4443_s7 + $0x28] sm:$0xff]   ;;  %v4261_v17 = vld [vmem:[%s4443_s7 + $0x38] sm:$0xff]  }
 0xf76   :  { %v1608_v19 = vpack.c.bf16 %v1607_v10, %v1607_v10 }
 0xf78   :  { %3170 = vmatmul.mubr.bf16.vlgmr.msra.gmra.mrb[36].mxu0 %v1608_v19 }
 0xf79   :  { %3209 = vmatprep.mubr.msk.bf16.mxu0 %vm3553_vm0, %v3552_v0 }
0x104b   :  { %v1643_v22 = vpop.f32.mrb[36].mxu0 }
0x104c   :  { %v1644_v27 = vadd.f32 %v3786_v6, %v1643_v22  ;;  %v3171_v28 = vpop.f32.mrb[37].mxu0 }
0x104d   :  { %v1646_v33 = vpop.f32.mrb[38].mxu0 }
0x104e   :  { %v2663_v55 = vmul.f32 -1.442695, %v1644_v27  ;;  %v3172_v21 = vpop.f32.mrb[39].mxu0 }
0x1050   :  { %3486 = vpow2.f32 %v2663_v55 }
0x105a   :  { %v3487_v37 = vpop.eup %3486 }
0x105b   :  { %v1652_v38 = vadd.f32 1.0, %v3487_v37 }
0x105d   :  { %3488 = vrcp.f32 %v1652_v38 }
0x1067   :  { %v4145_v20 = vpop.eup %3488 }
0x1068   :  { %v1655_v3 = vpack.c.bf16 %v4145_v20, %v4145_v20  ;;  %3490 = vtanh.f32 %v4145_v20 }
0x106a   :  { %3178 = vmatmul.mubr.msk.bf16.vlgmr.msra.gmra.mrb[76].mxu1 %vm88_vm4, %v1655_v3 }
0x106b   :  { %3182 = vmatpush3.bf16.msra.mxu1 %v4031_v24  ;;  %3185 = vmatprep.mubr.msk.bf16.mxu1 %vm3553_vm0, %v3552_v0 }
0x106c   :  { %3183 = vmatprep.subr.bf16.mxu1 %v3552_v0 }
0x106f   :  { %3184 = vmatpush3.bf16.msra.mxu1 %v4040_v26 }
0x1070   :  { %3189 = vmatprep.subr.bf16.mxu1 %v3552_v0 }
0x1072   :  { %v3491_v6 = vpop.eup %3490  ;;  %3186 = vmatmul.mubr.msk.bf16.vlgmr.msra.gmra.mrb[80].mxu1 %vm88_vm4, %v1655_v3 }
0x1073   :  { %1808 = vrot.lane.b32.xlu0 %v3491_v6, %s3555_s14  ;;  %3190 = vmatpush3.bf16.msra.mxu1 %v3636_v4 }
0x1074   :  { %3191 = vmatprep.mubr.msk.bf16.mxu1 %vm3553_vm0, %v3552_v0  ;;  %3195 = vmatprep.subr.bf16.mxu1 %v3552_v0 }
0x107a   :  { %3192 = vmatmul.mubr.msk.bf16.vlgmr.msra.gmra.mrb[84].mxu1 %vm132_vm2, %v2665_v42 }
0x107b   :  { %3196 = vmatpush3.bf16.msra.mxu1 %v4057_v29  ;;  %3203 = vmatprep.mubr.msk.bf16.mxu1 %vm3553_vm0, %v3552_v0 }
0x107c   :  { %3197 = vmatprep.subr.bf16.mxu1 %v3552_v0 }
0x107f   :  { %3198 = vmatpush3.bf16.msra.mxu1 %v4066_v30 }
0x1080   :  { %3199 = vmatprep.subr.bf16.mxu1 %v3552_v0 }
0x1083   :  { %3200 = vmatpush3.bf16.msra.mxu1 %v4073_v31 }
0x1084   :  { %3201 = vmatprep.subr.bf16.mxu1 %v3552_v0 }
0x1087   :  { %3202 = vmatpush3.bf16.msra.mxu1 %v4080_v32 }
0x1088   :  { %3233 = vmatprep.subr.bf16.mxu1 %v3552_v0 }
0x108a   :  { %3204 = vmatmul.mubr.msk.bf16.vlgmr.msra.gmra.mrb[88].mxu1 %vm237_vm5, %v1655_v3 }
0x108b   :  { %3234 = vmatpush3.bf16.msra.mxu1 %v4181_v43  ;;  %3237 = vmatprep.mubr.msk.bf16.mxu1 %vm3553_vm0, %v3552_v0 }
0x108c   :  { %3235 = vmatprep.subr.bf16.mxu1 %v3552_v0 }
0x108f   :  { %3236 = vmatpush3.bf16.msra.mxu1 %v4190_v49 }
0x1090   :  { %3241 = vmatprep.subr.bf16.mxu1 %v3552_v0 }
0x10e5   :  { %v1809_v55 = vpop.permute.xlu0 %1808 }
0x113d   :  { %v1693_v15 = vpop.f32.mrb[76].mxu1 }
0x113e   :  { %v4196_v23 = vsel %vm1699_vm10, %v1693_v15, %v4093_v36  ;;  %v3179_v50 = vpop.f32.mrb[77].mxu1 }
0x113f   :  { %v1696_v34 = vpop.f32.mrb[78].mxu1 }
0x1140   :  { %v3180_v7 = vpop.f32.mrb[79].mxu1 }
0x1145   :  { %v1737_v52 = vpop.f32.mrb[80].mxu1 }
0x1146   :  { %v3187_v53 = vpop.f32.mrb[81].mxu1 }
0x1147   :  { %v1740_v54 = vpop.f32.mrb[82].mxu1 }
0x1148   :  { %v3188_v57 = vpop.f32.mrb[83].mxu1 }
0x1149   :  { %v4275_v57 = vld [vmem:[%s4445_s8] ss:$0 sm:$0xff] }
0x114d   :  { %v1780_v58 = vpop.f32.mrb[84].mxu1 }
0x114e   :  { %v1781_v59 = vadd.f32 %v1780_v58, %v1737_v52  ;;  %v3193_v60 = vpop.f32.mrb[85].mxu1 }
0x114f   :  { %v1783_v61 = vpop.f32.mrb[86].mxu1 }
0x1150   :  { %v1786_v62 = vadd.f32 %v4098_v5, %v1781_v59  ;;  %v3194_v63 = vpop.f32.mrb[87].mxu1 }
0x1152   :  { %v2668_v12 = vmul.f32 -1.442695, %v1786_v62 }
0x1154   :  { %3492 = vpow2.f32 %v2668_v12 }
0x1155   :  { %3494 = vtanh.f32 %v1786_v62 }
0x115d   :  { %v1848_v13 = vpop.f32.mrb[88].mxu1 }
0x115e   :  { %v3493_v48 = vpop.eup %3492  ;;  %v1849_v36 = vadd.f32 %v4104_v56, %v1848_v13  ;;  %v3205_v39 = vpop.f32.mrb[89].mxu1 }
0x115f   :  { %v1790_v40 = vadd.f32 1.0, %v3493_v48  ;;  %v1851_v41 = vpop.f32.mrb[90].mxu1  ;;  %v3495_v16 = vpop.eup %3494 }
0x1160   :  { %v1854_v44 = vpack.c.bf16 %v1849_v36, %v1849_v36  ;;  %v3206_v45 = vpop.f32.mrb[91].mxu1  ;;  %v2673_v36 = vld [vmem:[%s4439_s0 + $0x18] sm:$0xf] }
0x1161   :  { %3496 = vrcp.f32 %v1790_v40 }
0x1162   :  { %v1856_v14 = vsel %vm136_vm1, %v1854_v44, 0 }
0x1163   :  { %3208 = vmatpush3.bf16.msra.mxu0 %v1856_v14 }
0x1164   :  { %3213 = vmatprep.subr.bf16.mxu0 %v3552_v0 }
0x1166   :  { %3210 = vmatmul.mubr.msk.bf16.vlgmr.msra.gmra.mrb[40].mxu0 %vm132_vm2, %v4112_v11 }
0x1167   :  { %3214 = vmatpush3.bf16.msra.mxu0 %v4207_v46  ;;  %3229 = vmatprep.mubr.msk.bf16.mxu0 %vm3553_vm0, %v3552_v0 }
0x1168   :  { %3215 = vmatprep.subr.bf16.mxu0 %v3552_v0 }
0x116b   :  { %v3497_v25 = vpop.eup %3496  ;;  %3216 = vmatpush3.bf16.msra.mxu0 %v4216_v18 }
0x116c   :  { %v1794_v47 = vsel %vm187_vm3, %v3497_v25, %v3495_v16  ;;  %3217 = vmatprep.subr.bf16.mxu0 %v3552_v0 }
0x116d   :  { %1797 = vrot.lane.b32.xlu1 %v1794_v47, %s3555_s14  ;;  %v1811_v21 = vmul.f32 %v1809_v55, %v1794_v47  ;;  %v1795_v6 = vmul.f32 %v4145_v20, %v1794_v47 }
0x116f   :  { %3218 = vmatpush3.bf16.msra.mxu0 %v4226_v51 }
0x1170   :  { %3219 = vmatprep.subr.bf16.mxu0 %v3552_v0 }
0x1173   :  { %3220 = vmatpush3.bf16.msra.mxu0 %v4233_v1 }
0x1174   :  { %3221 = vmatprep.subr.bf16.mxu0 %v3552_v0 }
0x1177   :  { %3222 = vmatpush3.bf16.msra.mxu0 %v4240_v2 }
0x1178   :  { %3223 = vmatprep.subr.bf16.mxu0 %v3552_v0 }
0x117b   :  { %3224 = vmatpush3.bf16.msra.mxu0 %v4247_v8 }
0x117c   :  { %3225 = vmatprep.subr.bf16.mxu0 %v3552_v0 }
0x117f   :  { %3226 = vmatpush3.bf16.msra.mxu0 %v4254_v9 }
0x1180   :  { %3227 = vmatprep.subr.bf16.mxu0 %v3552_v0 }
0x1183   :  { %3228 = vmatpush3.bf16.msra.mxu0 %v4261_v17 }
0x1184   :  { %3267 = vmatprep.subr.bf16.mxu0 %v3552_v0 }
0x11df   :  { %v1798_v10 = vpop.permute.xlu1 %1797 }
0x11e0   :  { %v1800_v19 = vmul.f32 %v1798_v10, %v1794_v47 }
0x11e2   :  { %1802 = vrot.lane.b32.xlu1 %v1800_v19, %s3555_s14 }
0x1239   :  { %v1892_v22 = vpop.f32.mrb[40].mxu0 }
0x123a   :  { %3498 = vtanh.f32 %v1892_v22  ;;  %v3211_v27 = vpop.f32.mrb[41].mxu0 }
0x123b   :  { %v1895_v28 = vpop.f32.mrb[42].mxu0 }
0x123c   :  { %v3212_v33 = vpop.f32.mrb[43].mxu0 }
0x1244   :  { %v3499_v37 = vpop.eup %3498 }
0x1245   :  { %v3391_v38 = vpack.i.bf16 %v3499_v37, %v1811_v21 }
0x1247   :  { %3392 = vrot.lane.b32.xlu0 %v3391_v38, %s3556_s30 }
0x1254   :  { %v1803_v3 = vpop.permute.xlu1 %1802 }
0x1255   :  { %v1805_v15 = vadd.f32 %v1803_v3, %v1795_v6 }
0x12b9   :  { %v3393_v42 = vpop.permute.xlu0 %3392 }
0x12ba   :  { %v3395_v50 = vunpack.i.h.bf16 %v3393_v42  ;;  %v3394_v34 = vunpack.i.l.bf16 %v3393_v42 }
0x12bc   :  { %v1907_v7 = vsel %vm88_vm4, %v3394_v34, %v1805_v15 }
0x12bd   :  { %v1908_v52 = vsel %vm237_vm5, %v1907_v7, %v3395_v50 }
0x12be   :  { %v1909_v53 = vpack.c.bf16 %v1908_v52, %v1908_v52 }
0x12c0   :  { %3230 = vmatmul.mubr.bf16.vlgmr.msra.gmra.mrb[44].mxu0 %v1909_v53 }
0x12c1   :  { %3269 = vmatprep.mubr.msk.bf16.mxu0 %vm3553_vm0, %v3552_v0 }
0x1393   :  { %v1944_v54 = vpop.f32.mrb[44].mxu0 }
0x1394   :  { %v1945_v20 = vadd.f32 %v4275_v57, %v1944_v54  ;;  %v3231_v58 = vpop.f32.mrb[45].mxu0 }
0x1395   :  { %v1947_v59 = vpop.f32.mrb[46].mxu0 }
0x1396   :  { %v2671_v60 = vmul.f32 -1.442695, %v1945_v20  ;;  %v3232_v61 = vpop.f32.mrb[47].mxu0 }
0x1398   :  { %3500 = vpow2.f32 %v2671_v60 }
0x13a2   :  { %v3501_v62 = vpop.eup %3500 }
0x13a3   :  { %v1953_v63 = vadd.f32 1.0, %v3501_v62 }
0x13a5   :  { %3502 = vrcp.f32 %v1953_v63 }
0x13af   :  { %v4278_v12 = vpop.eup %3502 }
0x13b0   :  { %v1956_v13 = vpack.c.bf16 %v4278_v12, %v4278_v12  ;;  %3504 = vtanh.f32 %v4278_v12 }
0x13b2   :  { %3238 = vmatmul.mubr.msk.bf16.vlgmr.msra.gmra.mrb[92].mxu1 %vm88_vm4, %v1956_v13 }
0x13b3   :  { %3242 = vmatpush3.bf16.msra.mxu1 %v4031_v24  ;;  %3245 = vmatprep.mubr.msk.bf16.mxu1 %vm3553_vm0, %v3552_v0 }
0x13b4   :  { %3243 = vmatprep.subr.bf16.mxu1 %v3552_v0 }
0x13b7   :  { %3244 = vmatpush3.bf16.msra.mxu1 %v4040_v26 }
0x13b8   :  { %3249 = vmatprep.subr.bf16.mxu1 %v3552_v0 }
0x13ba   :  { %v3505_v48 = vpop.eup %3504  ;;  %3246 = vmatmul.mubr.msk.bf16.vlgmr.msra.gmra.mrb[96].mxu1 %vm88_vm4, %v1956_v13 }
0x13bb   :  { %2109 = vrot.lane.b32.xlu0 %v3505_v48, %s3555_s14  ;;  %3250 = vmatpush3.bf16.msra.mxu1 %v3636_v4 }
0x13bc   :  { %3251 = vmatprep.mubr.msk.bf16.mxu1 %vm3553_vm0, %v3552_v0  ;;  %3255 = vmatprep.subr.bf16.mxu1 %v3552_v0 }
0x13c2   :  { %3252 = vmatmul.mubr.msk.bf16.vlgmr.msra.gmra.mrb[100].mxu1 %vm132_vm2, %v2673_v36 }
0x13c3   :  { %3256 = vmatpush3.bf16.msra.mxu1 %v4057_v29  ;;  %3263 = vmatprep.mubr.msk.bf16.mxu1 %vm3553_vm0, %v3552_v0 }
0x13c4   :  { %3257 = vmatprep.subr.bf16.mxu1 %v3552_v0 }
0x13c7   :  { %3258 = vmatpush3.bf16.msra.mxu1 %v4066_v30 }
0x13c8   :  { %3259 = vmatprep.subr.bf16.mxu1 %v3552_v0 }
0x13cb   :  { %3260 = vmatpush3.bf16.msra.mxu1 %v4073_v31 }
0x13cc   :  { %3261 = vmatprep.subr.bf16.mxu1 %v3552_v0 }
0x13cf   :  { %3262 = vmatpush3.bf16.msra.mxu1 %v4080_v32 }
0x13d0   :  { %3293 = vmatprep.subr.bf16.mxu1 %v3552_v0 }
0x13d2   :  { %3264 = vmatmul.mubr.msk.bf16.vlgmr.msra.gmra.mrb[104].mxu1 %vm237_vm5, %v1956_v13 }
0x13d3   :  { %3294 = vmatpush3.bf16.msra.mxu1 %v4181_v43  ;;  %3297 = vmatprep.mubr.msk.bf16.mxu1 %vm3553_vm0, %v3552_v0 }
0x13d4   :  { %3295 = vmatprep.subr.bf16.mxu1 %v3552_v0 }
0x13d7   :  { %3296 = vmatpush3.bf16.msra.mxu1 %v4190_v49 }
0x13d8   :  { %3301 = vmatprep.subr.bf16.mxu1 %v3552_v0 }
0x142d   :  { %v2110_v61 = vpop.permute.xlu0 %2109 }
0x1485   :  { %v1994_v39 = vpop.f32.mrb[92].mxu1 }
0x1486   :  { %v4319_v40 = vsel %vm2000_vm11, %v1994_v39, %v4196_v23  ;;  %v3239_v41 = vpop.f32.mrb[93].mxu1 }
0x1487   :  { %v1997_v44 = vpop.f32.mrb[94].mxu1 }
0x1488   :  { %v3240_v45 = vpop.f32.mrb[95].mxu1 }
0x148d   :  { %v2038_v14 = vpop.f32.mrb[96].mxu1 }
0x148e   :  { %v3247_v16 = vpop.f32.mrb[97].mxu1 }
0x148f   :  { %v2041_v25 = vpop.f32.mrb[98].mxu1 }
0x1490   :  { %v3248_v47 = vpop.f32.mrb[99].mxu1 }
0x1495   :  { %v2081_v10 = vpop.f32.mrb[100].mxu1 }
0x1496   :  { %v2082_v19 = vadd.f32 %v2081_v10, %v2038_v14  ;;  %v3253_v22 = vpop.f32.mrb[101].mxu1 }
0x1497   :  { %v2084_v27 = vpop.f32.mrb[102].mxu1 }
0x1498   :  { %v2087_v28 = vadd.f32 %v4098_v5, %v2082_v19  ;;  %v3254_v33 = vpop.f32.mrb[103].mxu1 }
0x149a   :  { %v2676_v55 = vmul.f32 -1.442695, %v2087_v28 }
0x149c   :  { %3506 = vpow2.f32 %v2676_v55 }
0x149d   :  { %3508 = vtanh.f32 %v2087_v28 }
0x14a5   :  { %v2149_v21 = vpop.f32.mrb[104].mxu1 }
0x14a6   :  { %v3507_v37 = vpop.eup %3506  ;;  %v2150_v23 = vadd.f32 %v4104_v56, %v2149_v21  ;;  %v3265_v38 = vpop.f32.mrb[105].mxu1 }
0x14a7   :  { %v2091_v3 = vadd.f32 1.0, %v3507_v37  ;;  %v2152_v6 = vpop.f32.mrb[106].mxu1  ;;  %v3509_v34 = vpop.eup %3508 }
0x14a8   :  { %v2155_v42 = vpack.c.bf16 %v2150_v23, %v2150_v23  ;;  %v3266_v15 = vpop.f32.mrb[107].mxu1 }
0x14a9   :  { %3510 = vrcp.f32 %v2091_v3 }
0x14aa   :  { %v2157_v50 = vsel %vm136_vm1, %v2155_v42, 0 }
0x14ab   :  { %3268 = vmatpush3.bf16.msra.mxu0 %v2157_v50 }
0x14ac   :  { %3273 = vmatprep.subr.bf16.mxu0 %v3552_v0 }
0x14ae   :  { %3270 = vmatmul.mubr.msk.bf16.vlgmr.msra.gmra.mrb[48].mxu0 %vm132_vm2, %v4112_v11 }
0x14af   :  { %3274 = vmatpush3.bf16.msra.mxu0 %v4207_v46  ;;  %3289 = vmatprep.mubr.msk.bf16.mxu0 %vm3553_vm0, %v3552_v0 }
0x14b0   :  { %3275 = vmatprep.subr.bf16.mxu0 %v3552_v0 }
0x14b3   :  { %v3511_v7 = vpop.eup %3510  ;;  %3276 = vmatpush3.bf16.msra.mxu0 %v4216_v18 }
0x14b4   :  { %v2095_v52 = vsel %vm187_vm3, %v3511_v7, %v3509_v34  ;;  %3277 = vmatprep.subr.bf16.mxu0 %v3552_v0 }
0x14b5   :  { %2098 = vrot.lane.b32.xlu1 %v2095_v52, %s3555_s14  ;;  %v2112_v62 = vmul.f32 %v2110_v61, %v2095_v52  ;;  %v2096_v36 = vmul.f32 %v4278_v12, %v2095_v52 }
0x14b7   :  { %3278 = vmatpush3.bf16.msra.mxu0 %v4226_v51 }
0x14b8   :  { %3279 = vmatprep.subr.bf16.mxu0 %v3552_v0 }
0x14bb   :  { %3280 = vmatpush3.bf16.msra.mxu0 %v4233_v1 }
0x14bc   :  { %3281 = vmatprep.subr.bf16.mxu0 %v3552_v0 }
0x14bf   :  { %3282 = vmatpush3.bf16.msra.mxu0 %v4240_v2 }
0x14c0   :  { %3283 = vmatprep.subr.bf16.mxu0 %v3552_v0 }
0x14c3   :  { %3284 = vmatpush3.bf16.msra.mxu0 %v4247_v8 }
0x14c4   :  { %3285 = vmatprep.subr.bf16.mxu0 %v3552_v0 }
0x14c7   :  { %3286 = vmatpush3.bf16.msra.mxu0 %v4254_v9 }
0x14c8   :  { %3287 = vmatprep.subr.bf16.mxu0 %v3552_v0 }
0x14cb   :  { %3288 = vmatpush3.bf16.msra.mxu0 %v4261_v17 }
0x14cc   :  { %3327 = vmatprep.subr.bf16.mxu0 %v3552_v0 }
0x1527   :  { %v2099_v53 = vpop.permute.xlu1 %2098 }
0x1528   :  { %v2101_v54 = vmul.f32 %v2099_v53, %v2095_v52 }
0x152a   :  { %2103 = vrot.lane.b32.xlu1 %v2101_v54, %s3555_s14 }
0x1581   :  { %v2193_v20 = vpop.f32.mrb[48].mxu0 }
0x1582   :  { %3512 = vtanh.f32 %v2193_v20  ;;  %v3271_v58 = vpop.f32.mrb[49].mxu0 }
0x1583   :  { %v2196_v59 = vpop.f32.mrb[50].mxu0 }
0x1584   :  { %v3272_v60 = vpop.f32.mrb[51].mxu0 }
0x158c   :  { %v3513_v63 = vpop.eup %3512 }
0x158d   :  { %v3396_v13 = vpack.i.bf16 %v3513_v63, %v2112_v62 }
0x158f   :  { %3397 = vrot.lane.b32.xlu0 %v3396_v13, %s3556_s30 }
0x159c   :  { %v2104_v48 = vpop.permute.xlu1 %2103 }
0x159d   :  { %v2106_v41 = vadd.f32 %v2104_v48, %v2096_v36 }
0x1601   :  { %v3398_v39 = vpop.permute.xlu0 %3397 }
0x1602   :  { %v3400_v44 = vunpack.i.h.bf16 %v3398_v39  ;;  %v3399_v45 = vunpack.i.l.bf16 %v3398_v39 }
0x1604   :  { %v2208_v14 = vsel %vm88_vm4, %v3399_v45, %v2106_v41 }
0x1605   :  { %v2209_v16 = vsel %vm237_vm5, %v2208_v14, %v3400_v44 }
0x1606   :  { %v2210_v25 = vpack.c.bf16 %v2209_v16, %v2209_v16 }
0x1608   :  { %3290 = vmatmul.mubr.bf16.vlgmr.msra.gmra.mrb[52].mxu0 %v2210_v25 }
0x1609   :  { %3329 = vmatprep.mubr.msk.bf16.mxu0 %vm3553_vm0, %v3552_v0 }
0x16db   :  { %v2245_v47 = vpop.f32.mrb[52].mxu0 }
0x16dc   :  { %v2246_v10 = vadd.f32 %v4275_v57, %v2245_v47  ;;  %v3291_v19 = vpop.f32.mrb[53].mxu0 }
0x16dd   :  { %v2248_v22 = vpop.f32.mrb[54].mxu0 }
0x16de   :  { %v2679_v27 = vmul.f32 -1.442695, %v2246_v10  ;;  %v3292_v12 = vpop.f32.mrb[55].mxu0 }
0x16e0   :  { %3514 = vpow2.f32 %v2679_v27 }
0x16ea   :  { %v3515_v28 = vpop.eup %3514 }
0x16eb   :  { %v2254_v33 = vadd.f32 1.0, %v3515_v28 }
0x16ed   :  { %3516 = vrcp.f32 %v2254_v33 }
0x16f7   :  { %v4356_v55 = vpop.eup %3516 }
0x16f8   :  { %v2257_v21 = vpack.c.bf16 %v4356_v55, %v4356_v55  ;;  %3518 = vtanh.f32 %v4356_v55 }
0x16fa   :  { %3298 = vmatmul.mubr.msk.bf16.vlgmr.msra.gmra.mrb[108].mxu1 %vm88_vm4, %v2257_v21 }
0x16fb   :  { %3302 = vmatpush3.bf16.msra.mxu1 %v4031_v24  ;;  %3305 = vmatprep.mubr.msk.bf16.mxu1 %vm3553_vm0, %v3552_v0  ;;  %v2681_v24 = vld [vmem:[%s4439_s0 + $0x1c] sm:$0xf] }
0x16fc   :  { %3303 = vmatprep.subr.bf16.mxu1 %v3552_v0 }
0x16ff   :  { %3304 = vmatpush3.bf16.msra.mxu1 %v4040_v26 }
0x1700   :  { %3309 = vmatprep.subr.bf16.mxu1 %v3552_v0 }
0x1702   :  { %v3519_v37 = vpop.eup %3518  ;;  %3306 = vmatmul.mubr.msk.bf16.vlgmr.msra.gmra.mrb[112].mxu1 %vm88_vm4, %v2257_v21 }
0x1703   :  { %2410 = vrot.lane.b32.xlu0 %v3519_v37, %s3555_s14  ;;  %3310 = vmatpush3.bf16.msra.mxu1 %v3636_v4 }
0x1704   :  { %3311 = vmatprep.mubr.msk.bf16.mxu1 %vm3553_vm0, %v3552_v0  ;;  %3315 = vmatprep.subr.bf16.mxu1 %v3552_v0 }
0x170a   :  { %3312 = vmatmul.mubr.msk.bf16.vlgmr.msra.gmra.mrb[116].mxu1 %vm132_vm2, %v2681_v24 }
0x170b   :  { %3316 = vmatpush3.bf16.msra.mxu1 %v4057_v29  ;;  %3323 = vmatprep.mubr.msk.bf16.mxu1 %vm3553_vm0, %v3552_v0 }
0x170c   :  { %3317 = vmatprep.subr.bf16.mxu1 %v3552_v0 }
0x170f   :  { %3318 = vmatpush3.bf16.msra.mxu1 %v4066_v30 }
0x1710   :  { %3319 = vmatprep.subr.bf16.mxu1 %v3552_v0 }
0x1713   :  { %3320 = vmatpush3.bf16.msra.mxu1 %v4073_v31 }
0x1714   :  { %3321 = vmatprep.subr.bf16.mxu1 %v3552_v0 }
0x1717   :  { %3322 = vmatpush3.bf16.msra.mxu1 %v4080_v32 }
0x1718   :  { %3353 = vmatprep.subr.bf16.mxu1 %v3552_v0 }
0x171a   :  { %3324 = vmatmul.mubr.msk.bf16.vlgmr.msra.gmra.mrb[120].mxu1 %vm237_vm5, %v2257_v21 }
0x171b   :  { %3354 = vmatpush3.bf16.msra.mxu1 %v4181_v43  ;;  %3357 = vmatprep.mubr.msk.bf16.mxu1 %vm3553_vm0, %v3552_v0 }
0x171c   :  { %3355 = vmatprep.subr.bf16.mxu1 %v3552_v0 }
0x171f   :  { %3356 = vmatpush3.bf16.msra.mxu1 %v4190_v49 }
0x1775   :  { %v2411_v62 = vpop.permute.xlu0 %2410 }
0x17cd   :  { %v2295_v4 = vpop.f32.mrb[108].mxu1 }
0x17ce   :  { %v4396_v26 = vsel %vm2301_vm12, %v2295_v4, %v4319_v40  ;;  %v3299_v29 = vpop.f32.mrb[109].mxu1 }
0x17cf   :  { %v2298_v30 = vpop.f32.mrb[110].mxu1 }
0x17d0   :  { %v3300_v31 = vpop.f32.mrb[111].mxu1 }
0x17d5   :  { %v2339_v32 = vpop.f32.mrb[112].mxu1 }
0x17d6   :  { %v3307_v23 = vpop.f32.mrb[113].mxu1 }
0x17d7   :  { %v2342_v38 = vpop.f32.mrb[114].mxu1 }
0x17d8   :  { %v3308_v43 = vpop.f32.mrb[115].mxu1 }
0x17dd   :  { %v2382_v3 = vpop.f32.mrb[116].mxu1 }
0x17de   :  { %v2383_v6 = vadd.f32 %v2382_v3, %v2339_v32  ;;  %v3313_v42 = vpop.f32.mrb[117].mxu1 }
0x17df   :  { %v2385_v15 = vpop.f32.mrb[118].mxu1 }
0x17e0   :  { %v2388_v50 = vadd.f32 %v4098_v5, %v2383_v6  ;;  %v3314_v49 = vpop.f32.mrb[119].mxu1 }
0x17e2   :  { %v2684_v34 = vmul.f32 -1.442695, %v2388_v50 }
0x17e4   :  { %3520 = vpow2.f32 %v2684_v34 }
0x17e5   :  { %3522 = vtanh.f32 %v2388_v50 }
0x17ed   :  { %v2450_v7 = vpop.f32.mrb[120].mxu1 }
0x17ee   :  { %v3521_v52 = vpop.eup %3520  ;;  %v2451_v40 = vadd.f32 %v4104_v56, %v2450_v7  ;;  %v3325_v53 = vpop.f32.mrb[121].mxu1 }
0x17ef   :  { %v2392_v54 = vadd.f32 1.0, %v3521_v52  ;;  %v2453_v20 = vpop.f32.mrb[122].mxu1  ;;  %v3523_v5 = vpop.eup %3522 }
0x17f0   :  { %v2456_v58 = vpack.c.bf16 %v2451_v40, %v2451_v40  ;;  %v3326_v59 = vpop.f32.mrb[123].mxu1 }
0x17f1   :  { %3524 = vrcp.f32 %v2392_v54 }
0x17f2   :  { %v2458_v60 = vsel %vm136_vm1, %v2456_v58, 0 }
0x17f3   :  { %3328 = vmatpush3.bf16.msra.mxu0 %v2458_v60 }
0x17f4   :  { %3333 = vmatprep.subr.bf16.mxu0 %v3552_v0 }
0x17f6   :  { %3330 = vmatmul.mubr.msk.bf16.vlgmr.msra.gmra.mrb[56].mxu0 %vm132_vm2, %v4112_v11 }
0x17f7   :  { %3334 = vmatpush3.bf16.msra.mxu0 %v4207_v46  ;;  %3349 = vmatprep.mubr.msk.bf16.mxu0 %vm3553_vm0, %v3552_v0 }
0x17f8   :  { %3335 = vmatprep.subr.bf16.mxu0 %v3552_v0 }
0x17fb   :  { %v3525_v56 = vpop.eup %3524  ;;  %3336 = vmatpush3.bf16.msra.mxu0 %v4216_v18 }
0x17fc   :  { %v2396_v61 = vsel %vm187_vm3, %v3525_v56, %v3523_v5  ;;  %3337 = vmatprep.subr.bf16.mxu0 %v3552_v0 }
0x17fd   :  { %2399 = vrot.lane.b32.xlu1 %v2396_v61, %s3555_s14  ;;  %v2413_v63 = vmul.f32 %v2411_v62, %v2396_v61 }
0x17ff   :  { %3338 = vmatpush3.bf16.msra.mxu0 %v4226_v51 }
0x1800   :  { %3339 = vmatprep.subr.bf16.mxu0 %v3552_v0 }
0x1803   :  { %3340 = vmatpush3.bf16.msra.mxu0 %v4233_v1 }
0x1804   :  { %3341 = vmatprep.subr.bf16.mxu0 %v3552_v0 }
0x1807   :  { %3342 = vmatpush3.bf16.msra.mxu0 %v4240_v2 }
0x1808   :  { %3343 = vmatprep.subr.bf16.mxu0 %v3552_v0 }
0x180b   :  { %3344 = vmatpush3.bf16.msra.mxu0 %v4247_v8 }
0x180c   :  { %3345 = vmatprep.subr.bf16.mxu0 %v3552_v0 }
0x180f   :  { %3346 = vmatpush3.bf16.msra.mxu0 %v4254_v9 }
0x1810   :  { %3347 = vmatprep.subr.bf16.mxu0 %v3552_v0  ;;  %v2397_v0 = vmul.f32 %v4356_v55, %v2396_v61 }
0x1813   :  { %3348 = vmatpush3.bf16.msra.mxu0 %v4261_v17 }
0x186f   :  { %v2400_v11 = vpop.permute.xlu1 %2399 }
0x1870   :  { %v2402_v46 = vmul.f32 %v2400_v11, %v2396_v61 }
0x1872   :  { %2404 = vrot.lane.b32.xlu1 %v2402_v46, %s3555_s14 }
0x18c9   :  { %v2494_v18 = vpop.f32.mrb[56].mxu0 }
0x18ca   :  { %3526 = vtanh.f32 %v2494_v18  ;;  %v3331_v51 = vpop.f32.mrb[57].mxu0 }
0x18cb   :  { %v2497_v1 = vpop.f32.mrb[58].mxu0 }
0x18cc   :  { %v3332_v2 = vpop.f32.mrb[59].mxu0 }
0x18d4   :  { %v3527_v8 = vpop.eup %3526 }
0x18d5   :  { %v3401_v13 = vpack.i.bf16 %v3527_v8, %v2413_v63 }
0x18d7   :  { %3402 = vrot.lane.b32.xlu0 %v3401_v13, %s3556_s30 }
0x18e4   :  { %v2405_v9 = vpop.permute.xlu1 %2404 }
0x18e5   :  { %v2407_v17 = vadd.f32 %v2405_v9, %v2397_v0 }
0x1949   :  { %v3403_v48 = vpop.permute.xlu0 %3402 }
0x194a   :  { %v3405_v36 = vunpack.i.h.bf16 %v3403_v48  ;;  %v3404_v39 = vunpack.i.l.bf16 %v3403_v48 }
0x194c   :  { %v2509_v41 = vsel %vm88_vm4, %v3404_v39, %v2407_v17 }
0x194d   :  { %v2510_v44 = vsel %vm237_vm5, %v2509_v41, %v3405_v36 }
0x194e   :  { %v2511_v45 = vpack.c.bf16 %v2510_v44, %v2510_v44 }
0x1950   :  { %3350 = vmatmul.mubr.bf16.vlgmr.msra.gmra.mrb[60].mxu0 %v2511_v45 }
0x1a23   :  { %v2546_v14 = vpop.f32.mrb[60].mxu0 }
0x1a24   :  { %v2547_v16 = vadd.f32 %v4275_v57, %v2546_v14  ;;  %v3351_v25 = vpop.f32.mrb[61].mxu0 }
0x1a25   :  { %v2549_v47 = vpop.f32.mrb[62].mxu0 }
0x1a26   :  { %v2687_v10 = vmul.f32 -1.442695, %v2547_v16  ;;  %v3352_v19 = vpop.f32.mrb[63].mxu0 }
0x1a28   :  { %3528 = vpow2.f32 %v2687_v10 }
0x1a32   :  { %v3529_v22 = vpop.eup %3528 }
0x1a33   :  { %v2555_v27 = vadd.f32 1.0, %v3529_v22 }
0x1a35   :  { %3530 = vrcp.f32 %v2555_v27 }
0x1a3f   :  { %v3531_v12 = vpop.eup %3530 }
0x1a40   :  { %v2558_v28 = vpack.c.bf16 %v3531_v12, %v3531_v12 }
0x1a42   :  { %3358 = vmatmul.mubr.msk.bf16.vlgmr.msra.gmra.mrb[124].mxu1 %vm88_vm4, %v2558_v28 }
0x1b15   :  { %v2596_v33 = vpop.f32.mrb[124].mxu1 }
0x1b16   :  { %v2603_v55 = vsel %vm2602_vm13, %v2596_v33, %v4396_v26  ;;  %v3359_v21 = vpop.f32.mrb[125].mxu1 }
0x1b17   :  { %2604 = vst [vmem:[%s4446_s10] sm:$0xff] %v2603_v55  ;;  %v2599_v57 = vpop.f32.mrb[126].mxu1 }
0x1b18   :  { %v3360_v37 = vpop.f32.mrb[127].mxu1 }

</bundles_post_ra>
